<compile_context>
chip_gen: v6e
topology: v6e:2x2x1
jax: 0.10.0
libtpu: 0.0.40
codegen_flags: <defaults>
</compile_context>

<pallas_src>
import functools

import jax
import jax.numpy as jnp
from jax.experimental import pallas as pl
from jax.experimental.pallas import tpu as pltpu


# ------------------------------- helpers --------------------------------------
def round_up(x, m):
    return (x + m - 1) // m * m


def next_pow2(n):
    n = max(int(n), 1)
    return 1 << (n - 1).bit_length()


def _pad2d(x, rows, cols):
    out = jnp.zeros((rows, cols), x.dtype)
    return out.at[: x.shape[0], : x.shape[1]].set(x)


# Scoped-VMEM cap: generous but <= v7x's 64 MiB physical (v5e/v6e have 128 MiB).
VMEM_LIMIT_BYTES = 48 * 1024 * 1024
# Budget for keeping the full src-feature matrix resident in VMEM.  Conservative
# so it fits all generations even if the (constant-index) block is double
# buffered by the pipeline.
# TODO(synk): raise per generation / single-buffer resident blocks with
# pipeline_mode=pl.Buffered(1) once broadly supported.
SRC_RESIDENT_BUDGET_BYTES = 10 * 1024 * 1024


def node_padding(n, tm_pref=256, tk_pref=512):
    """Pick dst tile (tm), src tile (tk) and padded row count for one node set.

    tm_pref / tk_pref must be powers of two (multiples of 8 / 128) so that the
    padded row count is a multiple of both the dst-role and src-role tiles.
    """
    p2 = next_pow2(n)
    tm = min(tm_pref, max(8, p2))
    tk = min(tk_pref, max(128, p2))
    n_pad = round_up(n, max(tm, tk))
    # v7x megacore: keep >=2 dst tiles when the whole set would fit one tile,
    # so the "parallel" grid axis can shard across both TensorCores.
    if n_pad == tm and tm >= 16:
        tm //= 2
    return n_pad, tm, tk


# ------------------------------------------------------------------------------
# Pallas kernel: one NGCF layer update for ONE node type (dst = users or items).
# ------------------------------------------------------------------------------
def ngcf_layer_kernel(feat_dst_ref, adj_ref, feat_src_ref, w1_ref, w2_ref,
                      b1_ref, b12_ref, out_ref, acc_ref,
                      *, d_in, tk, src_resident):
    k = pl.program_id(1)

    @pl.when(k == 0)
    def _():
        acc_ref[...] = jnp.zeros_like(acc_ref)

    # Neighborhood aggregation of raw source features (MXU, f32 accumulation).
    if src_resident:
        # Full H_src lives in VMEM; slice the tk rows matching this adj tile.
        start = pl.multiple_of(k * tk, tk)
        src = feat_src_ref[pl.ds(start, tk), :]
    else:
        src = feat_src_ref[...]
    acc_ref[...] += jnp.dot(adj_ref[...], src, preferred_element_type=jnp.float32)

    @pl.when(k == pl.num_programs(1) - 1)
    def _():
        agg = acc_ref[...]                              # [tm, dinp]  f32
        fd = feat_dst_ref[...].astype(jnp.float32)      # [tm, dinp]
        # rowsum(A) arrives for free in the "ones column" of the padded
        # features (column d_in), accumulated by the same MXU pass as agg.
        ns = agg[:, d_in:d_in + 1]                      # [tm, 1]
        # Two accumulating MXU dots; no VMEM staging scratch (no vst round-trip).
        x1 = (fd + agg).astype(w1_ref.dtype)            # self + aggregated -> W1
        x2 = (agg * fd).astype(w2_ref.dtype)            # u_mul_v aggregate  -> W2
        h = jnp.dot(x1, w1_ref[...], preferred_element_type=jnp.float32)
        h = h + jnp.dot(x2, w2_ref[...], preferred_element_type=jnp.float32)
        h = h + b1_ref[...].astype(jnp.float32) + ns * b12_ref[...].astype(jnp.float32)
        h = jnp.maximum(h, 0.2 * h)                     # LeakyReLU(0.2)
        # TODO(synk): training-mode dropout not emitted (eval-mode identity).
        # F.normalize(p=2, dim=1, eps=1e-12) via rsqrt (EUP slot, no divide).
        ss = jnp.sum(h * h, axis=1, keepdims=True)
        out_ref[...] = (h * jax.lax.rsqrt(jnp.maximum(ss, 1e-24))).astype(out_ref.dtype)


def ngcf_dense_update(feat_dst, adj, feat_src, w1p, w2p, b1p, b12p,
                      *, d_in, tm, tk, out_dtype):
    """One NGCF update for one destination node type via a dense adjacency."""
    n_dst, dinp = feat_dst.shape
    n_src = feat_src.shape[0]
    doutp = w1p.shape[1]
    assert n_dst % tm == 0 and n_src % tk == 0 and w1p.shape[0] == dinp
    grid = (n_dst // tm, n_src // tk)

    src_bytes = n_src * dinp * jnp.dtype(feat_src.dtype).itemsize
    src_resident = src_bytes <= SRC_RESIDENT_BUDGET_BYTES
    if src_resident:
        # Whole H_src resident in VMEM (constant block index -> fetched once).
        src_spec = pl.BlockSpec((n_src, dinp), lambda i, k: (0, 0))
    else:
        src_spec = pl.BlockSpec((tk, dinp), lambda i, k: (k, 0))

    kernel = functools.partial(ngcf_layer_kernel, d_in=d_in, tk=tk,
                               src_resident=src_resident)
    return pl.pallas_call(
        kernel,
        out_shape=jax.ShapeDtypeStruct((n_dst, doutp), out_dtype),
        grid_spec=pltpu.PrefetchScalarGridSpec(
            num_scalar_prefetch=0,
            grid=grid,
            in_specs=[
                pl.BlockSpec((tm, dinp), lambda i, k: (i, 0)),     # H_dst tile
                pl.BlockSpec((tm, tk), lambda i, k: (i, k)),       # adjacency tile
                src_spec,                                          # H_src (tile or resident)
                pl.BlockSpec((dinp, doutp), lambda i, k: (0, 0)),  # W1
                pl.BlockSpec((dinp, doutp), lambda i, k: (0, 0)),  # W2
                pl.BlockSpec((1, doutp), lambda i, k: (0, 0)),     # b1
                pl.BlockSpec((1, doutp), lambda i, k: (0, 0)),     # b1 + b2
            ],
            out_specs=pl.BlockSpec((tm, doutp), lambda i, k: (i, 0)),
            scratch_shapes=[pltpu.VMEM((tm, dinp), jnp.float32)],  # agg accumulator
        ),
        compiler_params=pltpu.CompilerParams(
            dimension_semantics=("parallel", "arbitrary"),
            vmem_limit_bytes=VMEM_LIMIT_BYTES),
    )(feat_dst, adj, feat_src, w1p, w2p, b1p, b12p)


# ------------------------------------------------------------------------------
# Parameter / graph construction (plain JAX glue, deterministic).
# ------------------------------------------------------------------------------
def xavier_uniform(key, shape):
    fan_in, fan_out = shape[0], shape[1]
    limit = jnp.sqrt(6.0 / (fan_in + fan_out))
    return jax.random.uniform(key, shape, jnp.float32, -limit, limit)


def build_graph(key, n_users, n_items):
    adj = jax.random.bernoulli(key, 0.25, (n_users, n_items))
    # guarantee every user and every item has at least one edge
    adj = adj.at[jnp.arange(n_users), jnp.arange(n_users) % n_items].set(True)
    adj = adj.at[jnp.arange(n_items) % n_users, jnp.arange(n_items)].set(True)
    adj = adj.astype(jnp.float32)                                   # [U, I]
    deg_user = adj.sum(axis=1)                                      # out-deg for 'ui'
    deg_item = adj.sum(axis=0)                                      # in-deg  for 'ui'
    # per-edge symmetric norm (identical for 'ui' and 'iu')
    w_norm = adj * (deg_user[:, None] * deg_item[None, :]) ** -0.5  # [U, I]
    return w_norm


def ngcf_forward(params, w_norm, users, pos_items, neg_items, *,
                 compute_dtype=jnp.bfloat16, tm_pref=256, tk_pref=512):
    feat_user = params["feat_user"]
    feat_item = params["feat_item"]
    n_u, in_size = feat_user.shape
    n_i = feat_item.shape[0]

    n_u_pad, tm_u, tk_u = node_padding(n_u, tm_pref, tk_pref)
    n_i_pad, tm_i, tk_i = node_padding(n_i, tm_pref, tk_pref)

    # Dense weighted bipartite adjacency + its transpose, built ONCE and reused
    # by every layer (only real quadrants of the graph, no structural zeros).
    a_ui = jnp.zeros((n_u_pad, n_i_pad), jnp.float32)
    a_ui = a_ui.at[:n_u, :n_i].set(w_norm).astype(compute_dtype)
    a_iu = jnp.zeros((n_i_pad, n_u_pad), jnp.float32)
    a_iu = a_iu.at[:n_i, :n_u].set(w_norm.T).astype(compute_dtype)

    def pad_feats(x, n_pad, d_real):
        dinp = round_up(d_real + 1, 128)
        out = jnp.zeros((n_pad, dinp), jnp.float32)
        out = out.at[: x.shape[0], :d_real].set(x)
        # normsum "ones column" (real rows ONLY, never pad rows)
        out = out.at[: x.shape[0], d_real].set(1.0)
        return out.astype(compute_dtype)

    hu = pad_feats(feat_user, n_u_pad, in_size)
    hi = pad_feats(feat_item, n_i_pad, in_size)

    user_embeds = [feat_user]
    item_embeds = [feat_item]
    d_in = in_size
    for layer in params["layers"]:
        w1, b1, w2, b2 = layer["w1"], layer["b1"], layer["w2"], layer["b2"]
        d_out = w1.shape[1]
        dinp = round_up(d_in + 1, 128)    # always >=1 spare column for the ones trick
        doutp = round_up(d_out + 1, 128)
        assert hu.shape[1] == dinp and hi.shape[1] == dinp
        # Hoisted padded parameters (once per layer, not per tile).
        w1p = _pad2d(w1, dinp, doutp).astype(compute_dtype)
        w2p = _pad2d(w2, dinp, doutp).astype(compute_dtype)
        b1p = _pad2d(b1, 1, doutp)                      # f32 (tiny)
        b12p = b1p + _pad2d(b2, 1, doutp)

        hu_new = ngcf_dense_update(hu, a_ui, hi, w1p, w2p, b1p, b12p,
                                   d_in=d_in, tm=tm_u, tk=tk_i,
                                   out_dtype=compute_dtype)
        hi_new = ngcf_dense_update(hi, a_iu, hu, w1p, w2p, b1p, b12p,
                                   d_in=d_in, tm=tm_i, tk=tk_u,
                                   out_dtype=compute_dtype)

        user_embeds.append(hu_new[:n_u, :d_out].astype(jnp.float32))
        item_embeds.append(hi_new[:n_i, :d_out].astype(jnp.float32))

        # Next-layer inputs: pad columns of the kernel output are exact zeros,
        # re-arm the ones column at d_out on REAL rows only.
        hu = hu_new.at[:n_u, d_out].set(jnp.asarray(1.0, hu_new.dtype))
        hi = hi_new.at[:n_i, d_out].set(jnp.asarray(1.0, hi_new.dtype))
        d_in = d_out

    user_embd = jnp.concatenate(user_embeds, axis=1)
    item_embd = jnp.concatenate(item_embeds, axis=1)
    return user_embd[users, :], item_embd[pos_items, :], item_embd[neg_items, :]


# ------------------------------------------------------------------------------
# Pure-JAX reference (same math, no Pallas, no padding) for a sanity check.
# ------------------------------------------------------------------------------
def _layer_ref(feat_dst, feat_src, adj, normsum, w1, b1, w2, b2):
    agg = adj @ feat_src
    h = (feat_dst @ w1 + b1) + (agg @ w1 + normsum * b1) + \
        ((agg * feat_dst) @ w2 + normsum * b2)
    h = jnp.where(h >= 0, h, 0.2 * h)
    nrm = jnp.maximum(jnp.sqrt(jnp.sum(h * h, axis=1, keepdims=True)), 1e-12)
    return h / nrm


def ngcf_forward_ref(params, w_norm, users, pos_items, neg_items):
    feat_user, feat_item = params["feat_user"], params["feat_item"]
    normsum_user = jnp.sum(w_norm, axis=1, keepdims=True)
    normsum_item = jnp.sum(w_norm, axis=0)[:, None]
    ue, ie = [feat_user], [feat_item]
    hu, hi = feat_user, feat_item
    for layer in params["layers"]:
        w1, b1, w2, b2 = layer["w1"], layer["b1"], layer["w2"], layer["b2"]
        nu = _layer_ref(hu, hi, w_norm, normsum_user, w1, b1, w2, b2)
        ni = _layer_ref(hi, hu, w_norm.T, normsum_item, w1, b1, w2, b2)
        hu, hi = nu, ni
        ue.append(hu)
        ie.append(hi)
    U = jnp.concatenate(ue, 1)
    I = jnp.concatenate(ie, 1)
    return U[users], I[pos_items], I[neg_items]


if __name__ == "__main__":
    key = jax.random.PRNGKey(0)
    n_users, n_items = 300, 520          # small, but forces multi-tile grids
    in_size = 64
    layer_size = [64, 32]

    k_graph, k_fu, k_fi, *k_layers = jax.random.split(key, 3 + 2 * len(layer_size))

    w_norm = build_graph(k_graph, n_users, n_items)

    params = {
        "feat_user": xavier_uniform(k_fu, (n_users, in_size)),
        "feat_item": xavier_uniform(k_fi, (n_items, in_size)),
        "layers": [],
    }
    d_in = in_size
    for li, d_out in enumerate(layer_size):
        kw1, kw2 = k_layers[2 * li], k_layers[2 * li + 1]
        # torch Linear weight is [out, in]; we store the transposed [in, out].
        params["layers"].append({
            "w1": xavier_uniform(kw1, (d_out, d_in)).T,
            "b1": jnp.zeros((1, d_out), jnp.float32),
            "w2": xavier_uniform(kw2, (d_out, d_in)).T,
            "b2": jnp.zeros((1, d_out), jnp.float32),
        })
        d_in = d_out

    users = jnp.array([0, 3, 7, 299], dtype=jnp.int32)
    pos_items = jnp.array([1, 5, 9, 519], dtype=jnp.int32)
    neg_items = jnp.array([2, 6, 10, 400], dtype=jnp.int32)

    # Pure-JAX reference.
    u_r, p_r, n_r = ngcf_forward_ref(params, w_norm, users, pos_items, neg_items)

    # f32 kernel path: exact-math validation of the Pallas kernel (tight check).
    u32, p32, n32 = ngcf_forward(params, w_norm, users, pos_items, neg_items,
                                 compute_dtype=jnp.float32)
    jax.block_until_ready((u32, p32, n32))
    assert jnp.allclose(u32, u_r, rtol=1e-4, atol=1e-5)
    assert jnp.allclose(p32, p_r, rtol=1e-4, atol=1e-5)
    assert jnp.allclose(n32, n_r, rtol=1e-4, atol=1e-5)

    # bf16 fast path (production config: bf16 streams, f32 MXU accumulation).
    u_g, pos_g, neg_g = ngcf_forward(params, w_norm, users, pos_items, neg_items,
                                     compute_dtype=jnp.bfloat16)
    jax.block_until_ready((u_g, pos_g, neg_g))
    assert jnp.allclose(u_g.astype(jnp.float32), u_r, rtol=1e-1, atol=2e-2)
    assert jnp.allclose(pos_g.astype(jnp.float32), p_r, rtol=1e-1, atol=2e-2)
    assert jnp.allclose(neg_g.astype(jnp.float32), n_r, rtol=1e-1, atol=2e-2)

    print("KERNEL_OK")
</pallas_src>

<mosaic_0001>
module attributes {stable_mosaic.version = 11 : i64} {
  func.func @ngcf_layer_kernel(%arg0: i32, %arg1: i32, %arg2: memref<256x128xf32, #tpu.memory_space<vmem>>, %arg3: memref<256x512xf32, #tpu.memory_space<vmem>>, %arg4: memref<1024x128xf32, #tpu.memory_space<vmem>>, %arg5: memref<128x128xf32, #tpu.memory_space<vmem>>, %arg6: memref<128x128xf32, #tpu.memory_space<vmem>>, %arg7: memref<1x128xf32, #tpu.memory_space<vmem>>, %arg8: memref<1x128xf32, #tpu.memory_space<vmem>>, %arg9: memref<256x128xf32, #tpu.memory_space<vmem>>, %arg10: memref<256x128xf32, #tpu.memory_space<vmem>>) attributes {dimension_semantics = [#tpu.dimension_semantics<parallel>, #tpu.dimension_semantics<arbitrary>], iteration_bounds = array<i64: 2, 2>, scalar_prefetch = 0 : i64, scratch_operands = 1 : i64, tpu.core_type = #tpu.core_type<tc>, window_params = [{transform_indices = @transform_0, window_bounds = array<i64: 256, 128>}, {transform_indices = @transform_1, window_bounds = array<i64: 256, 512>}, {pipeline_mode = #tpu.pipeline_mode<synchronous>, transform_indices = @transform_2, window_bounds = array<i64: 1024, 128>}, {pipeline_mode = #tpu.pipeline_mode<synchronous>, transform_indices = @transform_3, window_bounds = array<i64: 128, 128>}, {pipeline_mode = #tpu.pipeline_mode<synchronous>, transform_indices = @transform_4, window_bounds = array<i64: 128, 128>}, {pipeline_mode = #tpu.pipeline_mode<synchronous>, transform_indices = @transform_5, window_bounds = array<i64: 1, 128>}, {pipeline_mode = #tpu.pipeline_mode<synchronous>, transform_indices = @transform_6, window_bounds = array<i64: 1, 128>}, {transform_indices = @transform_7, window_bounds = array<i64: 256, 128>}]} {
    %c0_i32 = arith.constant 0 : i32
    %0 = arith.cmpi eq, %arg1, %c0_i32 : i32
    %1 = arith.extui %0 : i1 to i32
    %c0_i32_0 = arith.constant 0 : i32
    %2 = arith.cmpi ne, %1, %c0_i32_0 : i32
    scf.if %2 {
      %cst_8 = arith.constant 0.000000e+00 : f32
      %15 = vector.broadcast %cst_8 : f32 to vector<256x128xf32>
      %c0_9 = arith.constant 0 : index
      %c0_10 = arith.constant 0 : index
      %16 = vector.load %arg10[%c0_9, %c0_10] : memref<256x128xf32, #tpu.memory_space<vmem>>, vector<256x128xf32>
      tpu.vector_store %arg10[%c0_9, %c0_10], %15 {strides = array<i32>} : memref<256x128xf32, #tpu.memory_space<vmem>>, vector<256x128xf32>,
    } else {
    }
    %c512_i32 = arith.constant 512 : i32
    %3 = arith.muli %arg1, %c512_i32 : i32
    %4 = tpu.assume_multiple %3, 512 : i32
    %5 = arith.index_cast %4 : i32 to index
    %c0 = arith.constant 0 : index
    %6 = vector.load %arg4[%5, %c0] : memref<1024x128xf32, #tpu.memory_space<vmem>>, vector<512x128xf32>
    %c0_1 = arith.constant 0 : index
    %c0_2 = arith.constant 0 : index
    %7 = vector.load %arg10[%c0_1, %c0_2] : memref<256x128xf32, #tpu.memory_space<vmem>>, vector<256x128xf32>
    %c0_3 = arith.constant 0 : index
    %c0_4 = arith.constant 0 : index
    %8 = vector.load %arg3[%c0_3, %c0_4] : memref<256x512xf32, #tpu.memory_space<vmem>>, vector<256x512xf32>
    %cst = arith.constant dense<0.000000e+00> : vector<256x128xf32>
    %9 = tpu.matmul %8, %6, %cst {dimension_numbers = #tpu.dot_dimension_numbers<[1], [0], [0], [1], [0, 0, 1, 1], [], []>} : vector<256x512xf32>, vector<512x128xf32>, vector<256x128xf32> -> vector<256x128xf32>
    %10 = arith.addf %7, %9 : vector<256x128xf32>
    %c0_5 = arith.constant 0 : index
    %c0_6 = arith.constant 0 : index
    %11 = vector.load %arg10[%c0_5, %c0_6] : memref<256x128xf32, #tpu.memory_space<vmem>>, vector<256x128xf32>
    tpu.vector_store %arg10[%c0_5, %c0_6], %10 {strides = array<i32>} : memref<256x128xf32, #tpu.memory_space<vmem>>, vector<256x128xf32>,
    %c1_i32 = arith.constant 1 : i32
    %12 = arith.cmpi eq, %arg1, %c1_i32 : i32
    %13 = arith.extui %12 : i1 to i32
    %c0_i32_7 = arith.constant 0 : i32
    %14 = arith.cmpi ne, %13, %c0_i32_7 : i32
    scf.if %14 {
      %c0_8 = arith.constant 0 : index
      %c0_9 = arith.constant 0 : index
      %15 = vector.load %arg10[%c0_8, %c0_9] : memref<256x128xf32, #tpu.memory_space<vmem>>, vector<256x128xf32>
      %c0_10 = arith.constant 0 : index
      %c0_11 = arith.constant 0 : index
      %16 = vector.load %arg2[%c0_10, %c0_11] : memref<256x128xf32, #tpu.memory_space<vmem>>, vector<256x128xf32>
      %17 = vector.extract_strided_slice %15 {offsets = [0, 64], sizes = [256, 1], strides = [1, 1]} : vector<256x128xf32> to vector<256x1xf32>
      %18 = arith.addf %16, %15 : vector<256x128xf32>
      %19 = arith.mulf %15, %16 : vector<256x128xf32>
      %c0_12 = arith.constant 0 : index
      %c0_13 = arith.constant 0 : index
      %20 = vector.load %arg5[%c0_12, %c0_13] : memref<128x128xf32, #tpu.memory_space<vmem>>, vector<128x128xf32>
      %cst_14 = arith.constant dense<0.000000e+00> : vector<256x128xf32>
      %21 = tpu.matmul %18, %20, %cst_14 {dimension_numbers = #tpu.dot_dimension_numbers<[1], [0], [0], [1], [0, 0, 1, 1], [], []>} : vector<256x128xf32>, vector<128x128xf32>, vector<256x128xf32> -> vector<256x128xf32>
      %c0_15 = arith.constant 0 : index
      %c0_16 = arith.constant 0 : index
      %22 = vector.load %arg6[%c0_15, %c0_16] : memref<128x128xf32, #tpu.memory_space<vmem>>, vector<128x128xf32>
      %cst_17 = arith.constant dense<0.000000e+00> : vector<256x128xf32>
      %23 = tpu.matmul %19, %22, %cst_17 {dimension_numbers = #tpu.dot_dimension_numbers<[1], [0], [0], [1], [0, 0, 1, 1], [], []>} : vector<256x128xf32>, vector<128x128xf32>, vector<256x128xf32> -> vector<256x128xf32>
      %24 = arith.addf %21, %23 : vector<256x128xf32>
      %c0_18 = arith.constant 0 : index
      %c0_19 = arith.constant 0 : index
      %25 = vector.load %arg7[%c0_18, %c0_19] : memref<1x128xf32, #tpu.memory_space<vmem>>, vector<1x128xf32>
      %26 = vector.broadcast %25 : vector<1x128xf32> to vector<256x128xf32>
      %27 = arith.addf %24, %26 : vector<256x128xf32>
      %c0_20 = arith.constant 0 : index
      %c0_21 = arith.constant 0 : index
      %28 = vector.load %arg8[%c0_20, %c0_21] : memref<1x128xf32, #tpu.memory_space<vmem>>, vector<1x128xf32>
      %29 = vector.broadcast %17 : vector<256x1xf32> to vector<256x128xf32>
      %30 = vector.broadcast %28 : vector<1x128xf32> to vector<256x128xf32>
      %31 = arith.mulf %29, %30 : vector<256x128xf32>
      %32 = arith.addf %27, %31 : vector<256x128xf32>
      %cst_22 = arith.constant 2.000000e-01 : f32
      %33 = vector.broadcast %cst_22 : f32 to vector<256x128xf32>
      %34 = arith.mulf %33, %32 : vector<256x128xf32>
      %35 = arith.maximumf %32, %34 : vector<256x128xf32>
      %36 = arith.mulf %35, %35 : vector<256x128xf32>
      %cst_23 = arith.constant dense<0.000000e+00> : vector<256xf32>
      %37 = vector.multi_reduction <add>, %36, %cst_23 [1] : vector<256x128xf32> to vector<256xf32>
      %38 = vector.shape_cast %37 : vector<256xf32> to vector<256x1xf32>
      %cst_24 = arith.constant 1.000000e-24 : f32
      %39 = vector.broadcast %cst_24 : f32 to vector<256x1xf32>
      %40 = arith.maximumf %38, %39 : vector<256x1xf32>
      %41 = math.rsqrt %40 : vector<256x1xf32>
      %42 = vector.broadcast %41 : vector<256x1xf32> to vector<256x128xf32>
      %43 = arith.mulf %35, %42 : vector<256x128xf32>
      %c0_25 = arith.constant 0 : index
      %c0_26 = arith.constant 0 : index
      %44 = vector.load %arg9[%c0_25, %c0_26] : memref<256x128xf32, #tpu.memory_space<vmem>>, vector<256x128xf32>
      tpu.vector_store %arg9[%c0_25, %c0_26], %43 {strides = array<i32>} : memref<256x128xf32, #tpu.memory_space<vmem>>, vector<256x128xf32>,
    } else {
    }
    return
  }
  func.func @transform_0(%arg0: i32, %arg1: i32) -> (i32, i32) {
    %c0_i32 = arith.constant 0 : i32
    %c0_i32_0 = arith.constant 0 : i32
    return %arg0, %c0_i32 : i32, i32
  }
  func.func @transform_1(%arg0: i32, %arg1: i32) -> (i32, i32) {
    %c0_i32 = arith.constant 0 : i32
    return %arg0, %arg1 : i32, i32
  }
  func.func @transform_2(%arg0: i32, %arg1: i32) -> (i32, i32) {
    %c0_i32 = arith.constant 0 : i32
    %c0_i32_0 = arith.constant 0 : i32
    %c0_i32_1 = arith.constant 0 : i32
    return %c0_i32, %c0_i32_0 : i32, i32
  }
  func.func @transform_3(%arg0: i32, %arg1: i32) -> (i32, i32) {
    %c0_i32 = arith.constant 0 : i32
    %c0_i32_0 = arith.constant 0 : i32
    %c0_i32_1 = arith.constant 0 : i32
    return %c0_i32, %c0_i32_0 : i32, i32
  }
  func.func @transform_4(%arg0: i32, %arg1: i32) -> (i32, i32) {
    %c0_i32 = arith.constant 0 : i32
    %c0_i32_0 = arith.constant 0 : i32
    %c0_i32_1 = arith.constant 0 : i32
    return %c0_i32, %c0_i32_0 : i32, i32
  }
  func.func @transform_5(%arg0: i32, %arg1: i32) -> (i32, i32) {
    %c0_i32 = arith.constant 0 : i32
    %c0_i32_0 = arith.constant 0 : i32
    %c0_i32_1 = arith.constant 0 : i32
    return %c0_i32, %c0_i32_0 : i32, i32
  }
  func.func @transform_6(%arg0: i32, %arg1: i32) -> (i32, i32) {
    %c0_i32 = arith.constant 0 : i32
    %c0_i32_0 = arith.constant 0 : i32
    %c0_i32_1 = arith.constant 0 : i32
    return %c0_i32, %c0_i32_0 : i32, i32
  }
  func.func @transform_7(%arg0: i32, %arg1: i32) -> (i32, i32) {
    %c0_i32 = arith.constant 0 : i32
    %c0_i32_0 = arith.constant 0 : i32
    return %arg0, %c0_i32 : i32, i32
  }
}

</mosaic_0001>

<bundles_post_ra>
// kernel: tpu_custom_call.1
= control target key start
LH: loop header
LB: loop body
LE: loop exit
PB: predicated region body
PF: predicated region fallthrough
CT: control target
= control target key end

     0   :  { %s4399_s0 = inlined_call_operand.hbm [shape: f32[512,128], index: 0, kind: input, shape index: {}]   ;;  %s4400_s1 = inlined_call_operand.hbm [shape: f32[512,1024], index: 1, kind: input, shape index: {}]   ;;  %s4401_s2 = inlined_call_operand.hbm [shape: f32[1024,128], index: 2, kind: input, shape index: {}]   ;;  %s4402_s3 = inlined_call_operand.hbm [shape: f32[128,128], index: 3, kind: input, shape index: {}]   ;;  %s4403_s4 = inlined_call_operand.hbm [shape: f32[128,128], index: 4, kind: input, shape index: {}]   ;;  %s4404_s5 = inlined_call_operand.hbm [shape: f32[1,128], index: 5, kind: input, shape index: {}]   ;;  %s4405_s6 = inlined_call_operand.hbm [shape: f32[1,128], index: 6, kind: input, shape index: {}]   ;;  %s4406_s7 = inlined_call_operand.hbm [shape: f32[512,128], index: 7, kind: output, shape index: {}]  }
   0x1   :  { %4420 = sst [smem:[#allocation28_spill]] %s4401_s2 }
   0x2   :  { %4421 = sst [smem:[#allocation29_spill]] %s4402_s3 }
   0x3   :  { %4422 = sst [smem:[#allocation30_spill]] %s4403_s4 }
   0x4   :  { %4423 = sst [smem:[#allocation31_spill]] %s4404_s5 }
   0x5   :  { %4424 = sst [smem:[#allocation32_spill]] %s4405_s6 }
   0x6   :  { %4425 = sst [smem:[#allocation33_spill]] %s4406_s7 }
   0x7   :  { %12 = vsyncpa [#allocation4], 0 }
   0x8   :  { %14 = vsyncpa [#allocation4 + $0x1], 0 }
   0x9   :  { %15 = vsyncpa [#allocation7], 0 }
   0xa   :  { %17 = vsyncpa [#allocation7 + $0x1], 0 }
   0xb   :  { %18 = vsyncpa [#allocation10], 0 }
   0xc   :  { %19 = vsyncpa [#allocation13], 0 }
   0xd   :  { %20 = vsyncpa [#allocation5], 0 }
   0xe   :  { %22 = vsyncpa [#allocation5 + $0x1], 0  ;;  %s3458_s24 = smov 0   ;;  %s3460_s25 = smov 0  }
   0xf   :  { %s3462_s26 = smov 0   ;;  %s3464_s27 = smov 0  }
  0x10   :  { %s3466_s28 = smov 0   ;;  %s3468_s29 = smov 0  }
  0x11   :  { %s3470_s30 = smov 0   ;;  %s3472_s8 = smov 0  }
  0x12   :  { %s3474_s9 = smov 0   ;;  %s3476_s10 = smov 0  }
  0x13   :  { %s3478_s11 = smov 0  }
  0x14 LB: > { %4426 = sst [smem:[#allocation22_spill]] %s3382_s30  ;;  %s3514_s12 = sadd.s32 4294967295, %s3398_s11   ;;  %s3398_s11 = sphi %s3478_s11, %s28_s11   ;;  %s3394_s10 = sphi %s3476_s10, %s4479_s10   ;;  %s3390_s9 = sphi %s3474_s9, %s4478_s9   ;;  %s3386_s8 = sphi %s3472_s8, %s4477_s8   ;;  %s3382_s30 = sphi %s3470_s30, %s4476_s30   ;;  %s3378_s29 = sphi %s3468_s29, %s4475_s29   ;;  %s3374_s28 = sphi %s3466_s28, %s4474_s28   ;;  %s3370_s27 = sphi %s3464_s27, %s4473_s27   ;;  %s3366_s26 = sphi %s3462_s26, %s4472_s26   ;;  %s3362_s25 = sphi %s3460_s25, %s4471_s25   ;;  %s3358_s24 = sphi %s3458_s24, %s4470_s24  }
  0x15   : > { %4427 = sst [smem:[#allocation23_spill]] %s3386_s8  ;;  %p2549_p0 = scmp.ge.s32.totalorder %s3398_s11, 1 }
  0x16   : > { %p4412_p1 = scmp.eq.s32.totalorder %s3514_s12, 0  ;;  %p230_p2 = scmp.lt.s32.totalorder %s3398_s11, 5 }
  0x17   : > { %s3400_s14 = smov [#allocation8]   ;;  %s3401_s17 = smov [#allocation9]  }
  0x18   : > { %p3519_p3 = pnand %p2549_p0, %p230_p2  ;;  %s242_s15 = sshll.u32 %s3400_s14, 4  ;;  %s243_s15 = int_to_ptr.vmem [resolvable:$true] %s242_s15 }
  0x19   : > { %s255_s18 = sshll.u32 %s3401_s17, 4  ;;  %s3402_s19 = smov [#allocation12]   ;;  %s256_s18 = int_to_ptr.vmem [resolvable:$true] %s255_s18 }
  0x1a   : > { %p2868_p4 = pneg %p3519_p3  ;;  %s282_s20 = sshll.u32 %s3402_s19, 4  ;;  %s283_s20 = int_to_ptr.vmem [resolvable:$true] %s282_s20 }
  0x1b   : > { %s3087_s22 = scalar_lea.vmem %s243_s15, 16384  ;;  %p3095_p10 = scmp.lt.s32.totalorder %s243_s15, %s243_s15 }
  0x1c   : > { %p3527_p5 = pnand %p2868_p4, %p4412_p1  ;;  %p3088_p7 = scmp.ne.s32.totalorder %s243_s15, %s3087_s22 }
  0x1d   : > { %p3096_p11 = scmp.lt.s32.totalorder %s3087_s22, %s3087_s22 }
  0x1e   : > { %p3533_p6 = pneg %p3527_p5 }
  0x1f   : > { %p3097_p12 = por %p3096_p11, %p3095_p10 }
  0x20   : > { %p3090_p8 = pnand %p3088_p7, %p3533_p6 }
  0x22   : > { %p3091_p9 = pneg %p3090_p8 }
  0x24   : > { %p3098_p13 = pnand %p3097_p12, %p3091_p9 }
  0x26   : > { %3101 = shalt.err (!%p3098_p13)
}
  0x27   : > { %s4408_s23 = smov 128   ;;  %s4410_s14 = smov 8  }
  0x28   : > { %s4431_s2 = sld [smem:[#allocation28_spill]]  ;;  %s3113_s7 = scalar_lea.vmem %s256_s18, 2048 }
  0x29   : > { %p3114_p0 = scmp.ne.s32.totalorder %s256_s18, %s3113_s7  ;;  %p3121_p7 = scmp.lt.s32.totalorder %s256_s18, %s256_s18 }
  0x2a   : > { %p3122_p8 = scmp.lt.s32.totalorder %s3113_s7, %s3113_s7 }
  0x2b   : > { %p3116_p2 = pnand %p3114_p0, %p3533_p6 }
  0x2c   : > { %p3123_p9 = por %p3122_p8, %p3121_p7 }
  0x2d   : > { %p3117_p4 = pneg %p3116_p2 }
  0x2e   : > { %2871 = dma.hbm_to_vmem [thread:$0]  (!%p3527_p5), %s4431_s2, 16384, %s243_s15, [#allocation7], %s4408_s23, %s4408_s23, %s4410_s14  }
  0x2f   : > { %p3124_p10 = pnand %p3123_p9, %p3117_p4 }
  0x31   : > { %3127 = shalt.err (!%p3124_p10)
}
  0x32   : > { %s4432_s3 = sld [smem:[#allocation29_spill]]  ;;  %s3139_s15 = scalar_lea.vmem %s283_s20, 16 }
  0x33   : > { %p3140_p11 = scmp.ne.s32.totalorder %s283_s20, %s3139_s15  ;;  %s3146_s7 = scalar_lea.vmem %s283_s20, 32 }
  0x34   : > { %p3147_p0 = scmp.lt.s32.totalorder %s283_s20, %s283_s20  ;;  %p3148_p2 = scmp.lt.s32.totalorder %s3146_s7, %s3139_s15 }
  0x35   : > { %p3142_p12 = pnand %p3140_p11, %p3533_p6 }
  0x36   : > { %p3149_p4 = por %p3148_p2, %p3147_p0 }
  0x37   : > { %p3143_p13 = pneg %p3142_p12 }
  0x38   : > { %2874 = dma.hbm_to_vmem [thread:$0]  (!%p3527_p5), %s4432_s3, 2048, %s256_s18, [#allocation10], %s4408_s23, %s4408_s23, %s4410_s14  }
  0x39   : > { %p3150_p7 = pnand %p3149_p4, %p3143_p13 }
  0x3b   : > { %3153 = shalt.err (!%p3150_p7)
}
  0x3c   : > { %s4433_s5 = sld [smem:[#allocation31_spill]]  ;;  %s3405_s8 = smov [#allocation11]  }
  0x3d   : > { %s268_s18 = sshll.u32 %s3405_s8, 4  ;;  %s3406_s22 = smov [#allocation14]   ;;  %s269_s18 = int_to_ptr.vmem [resolvable:$true] %s268_s18 }
  0x3e   : > { %s293_s23 = sshll.u32 %s3406_s22, 4  ;;  %s3165_s14 = scalar_lea.vmem %s269_s18, 2048  ;;  %s294_s23 = int_to_ptr.vmem [resolvable:$true] %s293_s23 }
  0x3f   : > { %p3166_p8 = scmp.ne.s32.totalorder %s269_s18, %s3165_s14  ;;  %p3173_p11 = scmp.lt.s32.totalorder %s269_s18, %s269_s18 }
  0x40   : > { %p3174_p12 = scmp.lt.s32.totalorder %s3165_s14, %s3165_s14 }
  0x41   : > { %p3168_p9 = pnand %p3166_p8, %p3533_p6 }
  0x42   : > { %2880 = dma.hbm_to_vmem [thread:$0]  (!%p3527_p5), %s4433_s5, 16, %s283_s20, [#allocation13]  }
  0x43   : > { %p3169_p10 = pneg %p3168_p9  ;;  %p3175_p13 = por %p3174_p12, %p3173_p11 }
  0x45   : > { %p3176_p0 = pnand %p3175_p13, %p3169_p10 }
  0x47   : > { %3179 = shalt.err (!%p3176_p0)
}
  0x48   : > { %s4434_s15 = smov 8   ;;  %s4435_s7 = smov 128  }
  0x49   : > { %s4436_s4 = sld [smem:[#allocation30_spill]]  ;;  %s3191_s19 = scalar_lea.vmem %s294_s23, 16 }
  0x4a   : > { %p3192_p2 = scmp.ne.s32.totalorder %s294_s23, %s3191_s19  ;;  %s3198_s14 = scalar_lea.vmem %s294_s23, 32 }
  0x4b   : > { %p3199_p8 = scmp.lt.s32.totalorder %s294_s23, %s294_s23  ;;  %p3200_p9 = scmp.lt.s32.totalorder %s3198_s14, %s3191_s19 }
  0x4c   : > { %p3194_p4 = pnand %p3192_p2, %p3533_p6 }
  0x4d   : > { %p3201_p10 = por %p3200_p9, %p3199_p8 }
  0x4e   : > { %p3195_p7 = pneg %p3194_p4 }
  0x4f   : > { %2877 = dma.hbm_to_vmem [thread:$0]  (!%p3527_p5), %s4436_s4, 2048, %s269_s18, [#allocation10], %s4435_s7, %s4435_s7, %s4434_s15  }
  0x50   : > { %p3202_p11 = pnand %p3201_p10, %p3195_p7 }
  0x52   : > { %3205 = shalt.err (!%p3202_p11)
}
  0x53   : > { %s4437_s6 = sld [smem:[#allocation32_spill]]  ;;  %s2548_s16 = sadd.s32 4294967294, %s3398_s11  }
  0x54   : > { %s37_s21 = sadd.s32 1, %s3390_s9  ;;  %s40_s18 = sadd.s32 1, %s3394_s10 }
  0x55   : > { %p38_p6 = scmp.ge.s32.totalorder %s37_s21, 2  ;;  %s47_s20 = sadd.s32 1, %s3378_s29 }
  0x56   : > { %p54_p12 = scmp.ne.s32.totalorder %s3378_s29, %s3374_s28  ;;  %p4418_p13 = scmp.eq.s32.totalorder %s3398_s11, 0 }
  0x57   : > { %s4481_s21 = smov (%p38_p6, %s37_s21), 0  ;;  %s4483_s18 = smov (!%p38_p6, %s40_s18), %s3394_s10 }
  0x58   : > { %4438 = sst [smem:[#allocation24_spill]] %s4481_s21  ;;  %p3593_p0 = por %p4418_p13, %p54_p12 }
  0x59   : > { %2883 = dma.hbm_to_vmem [thread:$0]  (!%p3527_p5), %s4437_s6, 16, %s294_s23, [#allocation13]  }
  0x5a   : > { %p60_p5 = scmp.ne.s32.totalorder %s3374_s28, %s3370_s27  ;;  %p42_p2 = scmp.ge.s32.totalorder %s4483_s18, 2 }
  0x5b   : > { %s71_s23 = ssub.s32 %s3390_s9, %s4481_s21  ;;  %p217_p7 = scmp.eq.s32.totalorder %s3514_s12, 3 }
  0x5c   : > { %p3606_p4 = por %p4412_p1, %p60_p5  ;;  %s4485_s18 = smov (%p42_p2, %s4483_s18), 0 }
  0x5d   : > { %4441 = sst [smem:[#allocation25_spill]] %s4485_s18  ;;  %p3613_p8 = por %p217_p7, %p54_p12 }
  0x5e   : > { %p223_p9 = scmp.eq.s32.totalorder %s2548_s16, 3  ;;  %s44_s8 = ssub.s32 %s3394_s10, %s4485_s18 }
  0x5f   : > { %s4442_s14 = scalar_select %p3613_p8, 1, 0 }
  0x60   : > { %p2900_p10 = scmp.lt.s32.totalorder %s3398_s11, 4  ;;  %p45_p11 = scmp.eq.s32.totalorder %s44_s8, 0 }
  0x61   : > { %4443 = sst [smem:[#allocation26_spill]] %s4442_s14  ;;  %s3620_s22 = sor.u32 %s71_s23, %s44_s8 }
  0x62   : > { %p3626_p1 = por %p223_p9, %p60_p5  ;;  %s304_s4 = sand.u32 1, %s3378_s29  }
  0x63   : > { %s3631_s3 = scalar_select %p45_p11, %s3378_s29, %s47_s20  }
  0x64   : > { %s4444_s2 = scalar_select %p3626_p1, 1, 0 }
  0x65   : > { %4445 = sst [smem:[#allocation27_spill]] %s3631_s3  ;;  %s2583_s5 = sshll.u32 %s3394_s10, 12 }
  0x66   : > { %s2556_s6 = sshll.u32 %s304_s4, 8  ;;  %s314_s16 = scalar_lea.hbm %s4399_s0, %s2583_s5 }
  0x67   : > { %s308_s18 = scalar_lea.vmem [#allocation3], %s2556_s6  ;;  %p3642_p12 = pnand %p2900_p10, %p3593_p0 }
  0x68   : > { %s315_s30 = sshll.u32 %s308_s18, 4  ;;  %s305_s8 = scalar_lea.sflag [#allocation4], %s304_s4  ;;  %s316_s30 = int_to_ptr.vmem [resolvable:$true] %s315_s30 }
  0x69   : > { %p3208_p5 = pneg %p3642_p12  ;;  %s3219_s20 = scalar_lea.vmem %s316_s30, 4096 }
  0x6a   : > { %p3220_p2 = scmp.ne.s32.totalorder %s316_s30, %s3219_s20  ;;  %s3407_s3 = smov [#allocation3]  }
  0x6b   : > { %s3224_s21 = sshll.u32 %s3407_s3, 4  ;;  %s3225_s21 = int_to_ptr.vmem [resolvable:$false] %s3224_s21 }
  0x6c   : > { %p3222_p7 = pnand %p3220_p2, %p3208_p5  ;;  %s3226_s5 = scalar_lea.vmem %s3225_s21, 8192 }
  0x6d   : > { %p3227_p11 = scmp.lt.s32.totalorder %s316_s30, %s3225_s21  ;;  %p3228_p13 = scmp.lt.s32.totalorder %s3226_s5, %s3219_s20 }
  0x6e   : > { %p3223_p9 = pneg %p3222_p7 }
  0x6f   : > { %p3229_p6 = por %p3228_p13, %p3227_p11 }
  0x71   : > { %p3230_p0 = pnand %p3229_p6, %p3223_p9 }
  0x73   : > { %3233 = shalt.err (!%p3230_p0)
}
  0x74   : > { %2887 = dma.hbm_to_vmem [thread:$0]  (!%p3642_p12), %s314_s16, 4096, %s316_s30, %s305_s8, %s4435_s7, %s4435_s7, %s4434_s15  }
  0x75   : > { %s75_s3 = sadd.s32 1, %s3366_s26  ;;  %p82_p13 = scmp.ne.s32.totalorder %s3366_s26, %s3362_s25 }
  0x76   : > { %p4447_p6 = scmp.eq.s32.totalorder %s3620_s22, 0  ;;  %p4448_p5 = scmp.eq.s32.totalorder %s3398_s11, 0 }
  0x77   : > { %p88_p7 = scmp.ne.s32.totalorder %s3362_s25, %s3358_s24  ;;  %s325_s18 = sand.u32 1, %s3398_s11  }
  0x78   : > { %s3659_s4 = scalar_select %p4447_p6, %s3366_s26, %s75_s3  }
  0x79   : > { %p3663_p2 = por %p82_p13, %p4448_p5  ;;  %s327_s17 = sand.u32 1, %s3366_s26  }
  0x7a   : > { %p4450_p9 = scmp.eq.s32.totalorder %s3514_s12, 0  ;;  %s2559_s30 = sshll.u32 %s327_s17, 10 }
  0x7b   : > { %s2561_s15 = sshll.u32 %s3390_s9, 2  ;;  %s2584_s7 = sshll.u32 %s3394_s10, 8 }
  0x7c   : > { %p3673_p11 = por %p88_p7, %p4450_p9  ;;  %s336_s22 = sadd.s32 %s2584_s7, %s2561_s15 }
  0x7d   : > { %s329_s16 = scalar_lea.vmem [#allocation6], %s2559_s30  ;;  %s2563_s8 = sshll.u32 %s336_s22, 7 }
  0x7e   : > { %s339_s23 = sshll.u32 %s329_s16, 4  ;;  %s338_s5 = scalar_lea.hbm %s4400_s1, %s2563_s8  ;;  %s340_s23 = int_to_ptr.vmem [resolvable:$true] %s339_s23 }
  0x7f   : > { %p3686_p12 = pnand %p2900_p10, %p3663_p2  ;;  %s326_s3 = scalar_lea.sflag [#allocation7], %s325_s18 }
  0x80   : > { %s3247_s17 = scalar_lea.vmem %s340_s23, 16384  ;;  %s3408_s30 = smov [#allocation6]  }
  0x81   : > { %p3236_p0 = pneg %p3686_p12  ;;  %p3248_p13 = scmp.ne.s32.totalorder %s340_s23, %s3247_s17 }
  0x82   : > { %s3252_s15 = sshll.u32 %s3408_s30, 4  ;;  %s3253_s15 = int_to_ptr.vmem [resolvable:$false] %s3252_s15 }
  0x83   : > { %p3250_p6 = pnand %p3248_p13, %p3236_p0  ;;  %s3254_s7 = scalar_lea.vmem %s3253_s15, 32768 }
  0x84   : > { %p3255_p7 = scmp.lt.s32.totalorder %s340_s23, %s3253_s15  ;;  %p3256_p9 = scmp.lt.s32.totalorder %s3254_s7, %s3247_s17 }
  0x85   : > { %p3251_p5 = pneg %p3250_p6 }
  0x86   : > { %p3257_p1 = por %p3256_p9, %p3255_p7 }
  0x88   : > { %p3258_p8 = pnand %p3257_p1, %p3251_p5 }
  0x8a   : > { %3261 = shalt.err (!%p3258_p8)
}
  0x8b   : > { %s3409_s6 = smov 1024   ;;  %s3410_s22 = smov 512  }
  0x8c   : > { %s3411_s16 = smov 32   ;;  %351 = sbr.rel (%p3519_p3) target bundleno = 1077 (0x435), region = 48 }
  0x8d   : > { %2890 = dma.hbm_to_vmem [thread:$0]  (!%p3686_p12), %s338_s5, 16384, %s340_s23, %s326_s3, %s3409_s6, %s3410_s22, %s3411_s16  }
  0x8e   : > { %s3697_s18 = sand.u32 (!%p3519_p3), 1, %s3374_s28  }
  0x8f   : > { %s2565_s8 = sshll.u32 (!%p3519_p3), %s3697_s18, 8  ;;  %s354_s20 = scalar_lea.sflag (!%p3519_p3), [#allocation4], %s3697_s18 }
  0x90   : > { %s3701_s21 = scalar_lea.vmem (!%p3519_p3), [#allocation3], %s2565_s8 }
  0x91   : > { %3333 = dma.done.wait (%p3606_p4), %s354_s20, 4096  }
  0x92   : > { %3335 = vsyncadd (%p3606_p4), %s354_s20, 4294963200  ;;  %s362_s13 = sand.u32 1, %s3514_s12   ;;  %s364_s23 = sand.u32 1, %s3362_s25  }
  0x93   : > { %s2566_s5 = sshll.u32 %s364_s23, 10  ;;  %s363_s24 = scalar_lea.sflag [#allocation7], %s362_s13 }
  0x94   : > { %s3709_s3 = scalar_lea.vmem [#allocation6], %s2566_s5 }
  0x95   : > { %3337 = dma.done.wait (%p3673_p11), %s363_s24, 16384  }
  0x96   : > { %3339 = vsyncadd (%p3673_p11), %s363_s24, 4294950912  ;;  %p4453_p1 = scmp.eq.s32.totalorder %s3514_s12, 0 }
  0x98   : > { %3341 = dma.done.wait (%p4453_p1), [#allocation7], 16384   ;;  %p4454_p3 = pmov %p4453_p1 }
  0x99   : > { %p4455_p4 = pmov %p4453_p1 }
  0x9a   : > { %3343 = vsyncadd (%p4454_p3), [#allocation7], 4294950912 }
  0x9b   : > { %3345 = dma.done.wait (%p4455_p4), [#allocation10], 4096   ;;  %p4456_p8 = pmov %p4453_p1 }
  0x9c   : > { %p4457_p10 = pmov %p4453_p1 }
  0x9d   : > { %3347 = vsyncadd (%p4456_p8), [#allocation10], 4294963200 }
  0x9e   : > { %3349 = dma.done.wait (%p4457_p10), [#allocation13], 32   ;;  %p4458_p2 = pmov %p4453_p1 }
  0x9f   : > { %s3727_s19 = scalar_lea.vmem [#allocation15], %s2565_s8  ;;  %s4459_s14 = sld [smem:[#allocation22_spill]] }
  0xa0   : > { %3351 = vsyncadd (%p4458_p2), [#allocation13], 4294967264 }
  0xa5   : > { %p2573_p11 = scmp.ne.s32.totalorder %s4459_s14, 0 }
  0xa7   : > { %429 = sbr.rel (%p2573_p11) target bundleno = 189 (0xbd), region = 80 }
  0xac   : > { %v3412_v0 = vmov 0.0  }
  0xad   : > { %430 = vst [vmem:[#allocation2 + $0xb0] sm:$0xff] %v3412_v0  ;;  %431 = vst [vmem:[#allocation2] sm:$0xff] %v3412_v0 }
  0xae   : > { %432 = vst [vmem:[#allocation2 + $0xd8] sm:$0xff] %v3412_v0  ;;  %433 = vst [vmem:[#allocation2 + $0x18] sm:$0xff] %v3412_v0 }
  0xaf   : > { %434 = vst [vmem:[#allocation2 + $0x50] sm:$0xff] %v3412_v0  ;;  %435 = vst [vmem:[#allocation2 + $0x68] sm:$0xff] %v3412_v0 }
  0xb0   : > { %436 = vst [vmem:[#allocation2 + $0x30] sm:$0xff] %v3412_v0  ;;  %437 = vst [vmem:[#allocation2 + $0x48] sm:$0xff] %v3412_v0 }
  0xb1   : > { %438 = vst [vmem:[#allocation2 + $0x80] sm:$0xff] %v3412_v0  ;;  %439 = vst [vmem:[#allocation2 + $0x88] sm:$0xff] %v3412_v0 }
  0xb2   : > { %440 = vst [vmem:[#allocation2 + $0xe8] sm:$0xff] %v3412_v0  ;;  %441 = vst [vmem:[#allocation2 + $0xb8] sm:$0xff] %v3412_v0 }
  0xb3   : > { %442 = vst [vmem:[#allocation2 + $0x60] sm:$0xff] %v3412_v0  ;;  %443 = vst [vmem:[#allocation2 + $0xf0] sm:$0xff] %v3412_v0 }
  0xb4   : > { %444 = vst [vmem:[#allocation2 + $0x8] sm:$0xff] %v3412_v0  ;;  %445 = vst [vmem:[#allocation2 + $0x78] sm:$0xff] %v3412_v0 }
  0xb5   : > { %446 = vst [vmem:[#allocation2 + $0x38] sm:$0xff] %v3412_v0  ;;  %447 = vst [vmem:[#allocation2 + $0x58] sm:$0xff] %v3412_v0 }
  0xb6   : > { %448 = vst [vmem:[#allocation2 + $0x40] sm:$0xff] %v3412_v0  ;;  %449 = vst [vmem:[#allocation2 + $0xc8] sm:$0xff] %v3412_v0 }
  0xb7   : > { %450 = vst [vmem:[#allocation2 + $0xe0] sm:$0xff] %v3412_v0  ;;  %451 = vst [vmem:[#allocation2 + $0x90] sm:$0xff] %v3412_v0 }
  0xb8   : > { %452 = vst [vmem:[#allocation2 + $0x70] sm:$0xff] %v3412_v0  ;;  %453 = vst [vmem:[#allocation2 + $0xc0] sm:$0xff] %v3412_v0 }
  0xb9   : > { %454 = vst [vmem:[#allocation2 + $0xa8] sm:$0xff] %v3412_v0  ;;  %455 = vst [vmem:[#allocation2 + $0xd0] sm:$0xff] %v3412_v0 }
  0xba   : > { %456 = vst [vmem:[#allocation2 + $0x10] sm:$0xff] %v3412_v0  ;;  %457 = vst [vmem:[#allocation2 + $0x28] sm:$0xff] %v3412_v0 }
  0xbb   : > { %458 = vst [vmem:[#allocation2 + $0xa0] sm:$0xff] %v3412_v0  ;;  %459 = vst [vmem:[#allocation2 + $0xf8] sm:$0xff] %v3412_v0 }
  0xbc   : > { %460 = vst [vmem:[#allocation2 + $0x20] sm:$0xff] %v3412_v0  ;;  %461 = vst [vmem:[#allocation2 + $0x98] sm:$0xff] %v3412_v0 }
  0xbd PF: > { %s4460_s12 = sld [smem:[#allocation22_spill]]  ;;  %v561_v1 = vld [vmem:[%s3709_s3 + $0x8] sm:$0xff]  ;;  %v563_v2 = vld [vmem:[%s3709_s3 + $0x18] sm:$0xff]  ;;  %v3413_v3 = vmov 0.0  }
  0xbe   : > { %688 = vmatprep.subr.mxu0 %v3413_v3  ;;  %913 = vmatprep.subr.mxu1 %v3413_v3 }
  0xbf   : > { %752 = vmatprep.mubr.f32.mxu0 %v561_v1  ;;  %977 = vmatprep.mubr.f32.mxu1 %v563_v2 }
  0xc3   : > { %s2574_s17 = sshll.u32 %s4460_s12, 9  ;;  %p2575_p12 = scmp.ne.s32.totalorder %s4460_s12, 1 }
  0xc4   : > { %s3735_s30 = scalar_lea.vmem [#allocation8], %s2574_s17 }
  0xc5   : > { %v479_v4 = vld [vmem:[%s3735_s30 + $0x78] sm:$0xff]  ;;  %v478_v6 = vld [vmem:[%s3735_s30 + $0x70] sm:$0xff]  ;;  %v477_v8 = vld [vmem:[%s3735_s30 + $0x68] sm:$0xff] }
  0xc6   : > { %v511_v5 = vld [vmem:[%s3735_s30 + $0x178] sm:$0xff]  ;;  %689 = vmatpush1.msra.mxu0 %v479_v4  ;;  %v510_v7 = vld [vmem:[%s3735_s30 + $0x170] sm:$0xff]  ;;  %v509_v9 = vld [vmem:[%s3735_s30 + $0x168] sm:$0xff] }
  0xc7   : > { %914 = vmatpush1.msra.mxu1 %v511_v5  ;;  %690 = vmatprep.subr.mxu0 %v3413_v3  ;;  %v476_v10 = vld [vmem:[%s3735_s30 + $0x60] sm:$0xff]  ;;  %v475_v12 = vld [vmem:[%s3735_s30 + $0x58] sm:$0xff]  ;;  %v474_v14 = vld [vmem:[%s3735_s30 + $0x50] sm:$0xff] }
  0xc8   : > { %915 = vmatprep.subr.mxu1 %v3413_v3  ;;  %691 = vmatpush1.msra.mxu0 %v478_v6  ;;  %v508_v11 = vld [vmem:[%s3735_s30 + $0x160] sm:$0xff]  ;;  %v507_v13 = vld [vmem:[%s3735_s30 + $0x158] sm:$0xff]  ;;  %v506_v15 = vld [vmem:[%s3735_s30 + $0x150] sm:$0xff] }
  0xc9   : > { %916 = vmatpush1.msra.mxu1 %v510_v7  ;;  %692 = vmatprep.subr.mxu0 %v3413_v3  ;;  %v473_v16 = vld [vmem:[%s3735_s30 + $0x48] sm:$0xff]  ;;  %v472_v18 = vld [vmem:[%s3735_s30 + $0x40] sm:$0xff]  ;;  %v471_v20 = vld [vmem:[%s3735_s30 + $0x38] sm:$0xff] }
  0xca   : > { %917 = vmatprep.subr.mxu1 %v3413_v3  ;;  %693 = vmatpush1.msra.mxu0 %v477_v8  ;;  %v505_v17 = vld [vmem:[%s3735_s30 + $0x148] sm:$0xff]  ;;  %v504_v19 = vld [vmem:[%s3735_s30 + $0x140] sm:$0xff]  ;;  %v503_v21 = vld [vmem:[%s3735_s30 + $0x138] sm:$0xff] }
  0xcb   : > { %918 = vmatpush1.msra.mxu1 %v509_v9  ;;  %694 = vmatprep.subr.mxu0 %v3413_v3  ;;  %v470_v22 = vld [vmem:[%s3735_s30 + $0x30] sm:$0xff]  ;;  %v469_v24 = vld [vmem:[%s3735_s30 + $0x28] sm:$0xff]  ;;  %v468_v26 = vld [vmem:[%s3735_s30 + $0x20] sm:$0xff] }
  0xcc   : > { %919 = vmatprep.subr.mxu1 %v3413_v3  ;;  %695 = vmatpush1.msra.mxu0 %v476_v10  ;;  %v502_v23 = vld [vmem:[%s3735_s30 + $0x130] sm:$0xff]  ;;  %v501_v25 = vld [vmem:[%s3735_s30 + $0x128] sm:$0xff]  ;;  %v500_v27 = vld [vmem:[%s3735_s30 + $0x120] sm:$0xff] }
  0xcd   : > { %920 = vmatpush1.msra.mxu1 %v508_v11  ;;  %696 = vmatprep.subr.mxu0 %v3413_v3  ;;  %v467_v28 = vld [vmem:[%s3735_s30 + $0x18] sm:$0xff]  ;;  %v466_v30 = vld [vmem:[%s3735_s30 + $0x10] sm:$0xff]  ;;  %v465_v32 = vld [vmem:[%s3735_s30 + $0x8] sm:$0xff] }
  0xce   : > { %921 = vmatprep.subr.mxu1 %v3413_v3  ;;  %697 = vmatpush1.msra.mxu0 %v475_v12  ;;  %v499_v29 = vld [vmem:[%s3735_s30 + $0x118] sm:$0xff]  ;;  %v498_v31 = vld [vmem:[%s3735_s30 + $0x110] sm:$0xff]  ;;  %v497_v33 = vld [vmem:[%s3735_s30 + $0x108] sm:$0xff] }
  0xcf   : > { %922 = vmatpush1.msra.mxu1 %v507_v13  ;;  %698 = vmatprep.subr.mxu0 %v3413_v3  ;;  %v464_v34 = vld [vmem:[%s3735_s30] sm:$0xff]  ;;  %v495_v36 = vld [vmem:[%s3735_s30 + $0xf8] sm:$0xff]  ;;  %v494_v38 = vld [vmem:[%s3735_s30 + $0xf0] sm:$0xff] }
  0xd0   : > { %923 = vmatprep.subr.mxu1 %v3413_v3  ;;  %699 = vmatpush1.msra.mxu0 %v474_v14  ;;  %v496_v35 = vld [vmem:[%s3735_s30 + $0x100] sm:$0xff]  ;;  %v527_v37 = vld [vmem:[%s3735_s30 + $0x1f8] sm:$0xff]  ;;  %v526_v39 = vld [vmem:[%s3735_s30 + $0x1f0] sm:$0xff] }
  0xd1   : > { %924 = vmatpush1.msra.mxu1 %v506_v15  ;;  %700 = vmatprep.subr.mxu0 %v3413_v3  ;;  %v493_v40 = vld [vmem:[%s3735_s30 + $0xe8] sm:$0xff]  ;;  %v492_v42 = vld [vmem:[%s3735_s30 + $0xe0] sm:$0xff]  ;;  %v491_v44 = vld [vmem:[%s3735_s30 + $0xd8] sm:$0xff] }
  0xd2   : > { %925 = vmatprep.subr.mxu1 %v3413_v3  ;;  %701 = vmatpush1.msra.mxu0 %v473_v16  ;;  %v525_v41 = vld [vmem:[%s3735_s30 + $0x1e8] sm:$0xff]  ;;  %v524_v43 = vld [vmem:[%s3735_s30 + $0x1e0] sm:$0xff]  ;;  %v523_v45 = vld [vmem:[%s3735_s30 + $0x1d8] sm:$0xff] }
  0xd3   : > { %926 = vmatpush1.msra.mxu1 %v505_v17  ;;  %702 = vmatprep.subr.mxu0 %v3413_v3  ;;  %v490_v46 = vld [vmem:[%s3735_s30 + $0xd0] sm:$0xff]  ;;  %v489_v48 = vld [vmem:[%s3735_s30 + $0xc8] sm:$0xff]  ;;  %v488_v50 = vld [vmem:[%s3735_s30 + $0xc0] sm:$0xff] }
  0xd4   : > { %927 = vmatprep.subr.mxu1 %v3413_v3  ;;  %703 = vmatpush1.msra.mxu0 %v472_v18  ;;  %v522_v47 = vld [vmem:[%s3735_s30 + $0x1d0] sm:$0xff]  ;;  %v521_v49 = vld [vmem:[%s3735_s30 + $0x1c8] sm:$0xff]  ;;  %v520_v51 = vld [vmem:[%s3735_s30 + $0x1c0] sm:$0xff] }
  0xd5   : > { %928 = vmatpush1.msra.mxu1 %v504_v19  ;;  %704 = vmatprep.subr.mxu0 %v3413_v3  ;;  %v487_v52 = vld [vmem:[%s3735_s30 + $0xb8] sm:$0xff]  ;;  %v486_v54 = vld [vmem:[%s3735_s30 + $0xb0] sm:$0xff]  ;;  %v485_v56 = vld [vmem:[%s3735_s30 + $0xa8] sm:$0xff] }
  0xd6   : > { %929 = vmatprep.subr.mxu1 %v3413_v3  ;;  %705 = vmatpush1.msra.mxu0 %v471_v20  ;;  %v519_v53 = vld [vmem:[%s3735_s30 + $0x1b8] sm:$0xff]  ;;  %v518_v55 = vld [vmem:[%s3735_s30 + $0x1b0] sm:$0xff]  ;;  %v517_v57 = vld [vmem:[%s3735_s30 + $0x1a8] sm:$0xff] }
  0xd7   : > { %930 = vmatpush1.msra.mxu1 %v503_v21  ;;  %706 = vmatprep.subr.mxu0 %v3413_v3  ;;  %v484_v58 = vld [vmem:[%s3735_s30 + $0xa0] sm:$0xff]  ;;  %v483_v60 = vld [vmem:[%s3735_s30 + $0x98] sm:$0xff]  ;;  %v482_v62 = vld [vmem:[%s3735_s30 + $0x90] sm:$0xff] }
  0xd8   : > { %931 = vmatprep.subr.mxu1 %v3413_v3  ;;  %707 = vmatpush1.msra.mxu0 %v470_v22  ;;  %v516_v59 = vld [vmem:[%s3735_s30 + $0x1a0] sm:$0xff]  ;;  %v515_v61 = vld [vmem:[%s3735_s30 + $0x198] sm:$0xff]  ;;  %v514_v63 = vld [vmem:[%s3735_s30 + $0x190] sm:$0xff] }
  0xd9   : > { %932 = vmatpush1.msra.mxu1 %v502_v23  ;;  %708 = vmatprep.subr.mxu0 %v3413_v3  ;;  %v481_v0 = vld [vmem:[%s3735_s30 + $0x88] sm:$0xff]  ;;  %v480_v2 = vld [vmem:[%s3735_s30 + $0x80] sm:$0xff]  ;;  %v562_v6 = vld [vmem:[%s3709_s3 + $0x10] sm:$0xff] }
  0xda   : > { %933 = vmatprep.subr.mxu1 %v3413_v3  ;;  %709 = vmatpush1.msra.mxu0 %v469_v24  ;;  %v513_v1 = vld [vmem:[%s3735_s30 + $0x188] sm:$0xff]  ;;  %v512_v4 = vld [vmem:[%s3735_s30 + $0x180] sm:$0xff]  ;;  %v567_v8 = vld [vmem:[%s3709_s3 + $0x38] sm:$0xff] }
  0xdb   : > { %934 = vmatpush1.msra.mxu1 %v501_v25  ;;  %710 = vmatprep.subr.mxu0 %v3413_v3  ;;  %v560_v5 = vld [vmem:[%s3709_s3] sm:$0xff]  ;;  %v565_v7 = vld [vmem:[%s3709_s3 + $0x28] sm:$0xff]  ;;  %v566_v10 = vld [vmem:[%s3709_s3 + $0x30] sm:$0xff] }
  0xdc   : > { %935 = vmatprep.subr.mxu1 %v3413_v3  ;;  %711 = vmatpush1.msra.mxu0 %v468_v26  ;;  %v564_v9 = vld [vmem:[%s3709_s3 + $0x20] sm:$0xff]  ;;  %v569_v11 = vld [vmem:[%s3709_s3 + $0x48] sm:$0xff]  ;;  %v571_v12 = vld [vmem:[%s3709_s3 + $0x58] sm:$0xff] }
  0xdd   : > { %936 = vmatpush1.msra.mxu1 %v500_v27  ;;  %712 = vmatprep.subr.mxu0 %v3413_v3  ;;  %v570_v13 = vld [vmem:[%s3709_s3 + $0x50] sm:$0xff]  ;;  %v573_v14 = vld [vmem:[%s3709_s3 + $0x68] sm:$0xff]  ;;  %v575_v15 = vld [vmem:[%s3709_s3 + $0x78] sm:$0xff] }
  0xde   : > { %937 = vmatprep.subr.mxu1 %v3413_v3  ;;  %713 = vmatpush1.msra.mxu0 %v467_v28  ;;  %v572_v16 = vld [vmem:[%s3709_s3 + $0x60] sm:$0xff]  ;;  %v574_v17 = vld [vmem:[%s3709_s3 + $0x70] sm:$0xff]  ;;  %v577_v18 = vld [vmem:[%s3709_s3 + $0x88] sm:$0xff] }
  0xdf   : > { %938 = vmatpush1.msra.mxu1 %v499_v29  ;;  %714 = vmatprep.subr.mxu0 %v3413_v3  ;;  %v579_v19 = vld [vmem:[%s3709_s3 + $0x98] sm:$0xff]  ;;  %v576_v20 = vld [vmem:[%s3709_s3 + $0x80] sm:$0xff]  ;;  %v578_v21 = vld [vmem:[%s3709_s3 + $0x90] sm:$0xff] }
  0xe0   : > { %939 = vmatprep.subr.mxu1 %v3413_v3  ;;  %715 = vmatpush1.msra.mxu0 %v466_v30  ;;  %v581_v22 = vld [vmem:[%s3709_s3 + $0xa8] sm:$0xff]  ;;  %v583_v23 = vld [vmem:[%s3709_s3 + $0xb8] sm:$0xff]  ;;  %v580_v24 = vld [vmem:[%s3709_s3 + $0xa0] sm:$0xff] }
  0xe1   : > { %940 = vmatpush1.msra.mxu1 %v498_v31  ;;  %716 = vmatprep.subr.mxu0 %v3413_v3  ;;  %v582_v25 = vld [vmem:[%s3709_s3 + $0xb0] sm:$0xff]  ;;  %v585_v26 = vld [vmem:[%s3709_s3 + $0xc8] sm:$0xff]  ;;  %v587_v27 = vld [vmem:[%s3709_s3 + $0xd8] sm:$0xff] }
  0xe2   : > { %941 = vmatprep.subr.mxu1 %v3413_v3  ;;  %717 = vmatpush1.msra.mxu0 %v465_v32  ;;  %v584_v28 = vld [vmem:[%s3709_s3 + $0xc0] sm:$0xff]  ;;  %v586_v29 = vld [vmem:[%s3709_s3 + $0xd0] sm:$0xff]  ;;  %v589_v30 = vld [vmem:[%s3709_s3 + $0xe8] sm:$0xff] }
  0xe3   : > { %942 = vmatpush1.msra.mxu1 %v497_v33  ;;  %718 = vmatprep.subr.mxu0 %v3413_v3  ;;  %v591_v31 = vld [vmem:[%s3709_s3 + $0xf8] sm:$0xff]  ;;  %v588_v32 = vld [vmem:[%s3709_s3 + $0xe0] sm:$0xff]  ;;  %v590_v33 = vld [vmem:[%s3709_s3 + $0xf0] sm:$0xff] }
  0xe4   : > { %943 = vmatprep.subr.mxu1 %v3413_v3  ;;  %719 = vmatpush1.msra.mxu0 %v464_v34  ;;  %v593_v34 = vld [vmem:[%s3709_s3 + $0x108] sm:$0xff] }
  0xe5   : > { %944 = vmatpush1.msra.mxu1 %v496_v35  ;;  %720 = vmatprep.subr.mxu0 %v3413_v3  ;;  %v595_v35 = vld [vmem:[%s3709_s3 + $0x118] sm:$0xff] }
  0xe6   : > { %945 = vmatprep.subr.mxu1 %v3413_v3  ;;  %721 = vmatpush2.msra.mxu0 %v495_v36  ;;  %v592_v36 = vld [vmem:[%s3709_s3 + $0x100] sm:$0xff] }
  0xe7   : > { %946 = vmatpush2.msra.mxu1 %v527_v37  ;;  %722 = vmatprep.subr.mxu0 %v3413_v3  ;;  %v594_v37 = vld [vmem:[%s3709_s3 + $0x110] sm:$0xff] }
  0xe8   : > { %947 = vmatprep.subr.mxu1 %v3413_v3  ;;  %723 = vmatpush2.msra.mxu0 %v494_v38  ;;  %v597_v38 = vld [vmem:[%s3709_s3 + $0x128] sm:$0xff] }
  0xe9   : > { %948 = vmatpush2.msra.mxu1 %v526_v39  ;;  %724 = vmatprep.subr.mxu0 %v3413_v3  ;;  %v599_v39 = vld [vmem:[%s3709_s3 + $0x138] sm:$0xff] }
  0xea   : > { %949 = vmatprep.subr.mxu1 %v3413_v3  ;;  %725 = vmatpush2.msra.mxu0 %v493_v40  ;;  %v596_v40 = vld [vmem:[%s3709_s3 + $0x120] sm:$0xff] }
  0xeb   : > { %950 = vmatpush2.msra.mxu1 %v525_v41  ;;  %726 = vmatprep.subr.mxu0 %v3413_v3  ;;  %v598_v41 = vld [vmem:[%s3709_s3 + $0x130] sm:$0xff] }
  0xec   : > { %951 = vmatprep.subr.mxu1 %v3413_v3  ;;  %727 = vmatpush2.msra.mxu0 %v492_v42  ;;  %v601_v42 = vld [vmem:[%s3709_s3 + $0x148] sm:$0xff] }
  0xed   : > { %952 = vmatpush2.msra.mxu1 %v524_v43  ;;  %728 = vmatprep.subr.mxu0 %v3413_v3  ;;  %v603_v43 = vld [vmem:[%s3709_s3 + $0x158] sm:$0xff] }
  0xee   : > { %953 = vmatprep.subr.mxu1 %v3413_v3  ;;  %729 = vmatpush2.msra.mxu0 %v491_v44  ;;  %v600_v44 = vld [vmem:[%s3709_s3 + $0x140] sm:$0xff] }
  0xef   : > { %954 = vmatpush2.msra.mxu1 %v523_v45  ;;  %730 = vmatprep.subr.mxu0 %v3413_v3  ;;  %v602_v45 = vld [vmem:[%s3709_s3 + $0x150] sm:$0xff] }
  0xf0   : > { %955 = vmatprep.subr.mxu1 %v3413_v3  ;;  %731 = vmatpush2.msra.mxu0 %v490_v46  ;;  %v605_v46 = vld [vmem:[%s3709_s3 + $0x168] sm:$0xff] }
  0xf1   : > { %956 = vmatpush2.msra.mxu1 %v522_v47  ;;  %732 = vmatprep.subr.mxu0 %v3413_v3  ;;  %v607_v47 = vld [vmem:[%s3709_s3 + $0x178] sm:$0xff] }
  0xf2   : > { %957 = vmatprep.subr.mxu1 %v3413_v3  ;;  %733 = vmatpush2.msra.mxu0 %v489_v48  ;;  %v604_v48 = vld [vmem:[%s3709_s3 + $0x160] sm:$0xff] }
  0xf3   : > { %958 = vmatpush2.msra.mxu1 %v521_v49  ;;  %734 = vmatprep.subr.mxu0 %v3413_v3  ;;  %v606_v49 = vld [vmem:[%s3709_s3 + $0x170] sm:$0xff] }
  0xf4   : > { %959 = vmatprep.subr.mxu1 %v3413_v3  ;;  %735 = vmatpush2.msra.mxu0 %v488_v50  ;;  %v609_v50 = vld [vmem:[%s3709_s3 + $0x188] sm:$0xff] }
  0xf5   : > { %960 = vmatpush2.msra.mxu1 %v520_v51  ;;  %736 = vmatprep.subr.mxu0 %v3413_v3  ;;  %v611_v51 = vld [vmem:[%s3709_s3 + $0x198] sm:$0xff] }
  0xf6   : > { %961 = vmatprep.subr.mxu1 %v3413_v3  ;;  %737 = vmatpush2.msra.mxu0 %v487_v52  ;;  %v608_v52 = vld [vmem:[%s3709_s3 + $0x180] sm:$0xff] }
  0xf7   : > { %962 = vmatpush2.msra.mxu1 %v519_v53  ;;  %738 = vmatprep.subr.mxu0 %v3413_v3  ;;  %v610_v53 = vld [vmem:[%s3709_s3 + $0x190] sm:$0xff] }
  0xf8   : > { %963 = vmatprep.subr.mxu1 %v3413_v3  ;;  %739 = vmatpush2.msra.mxu0 %v486_v54  ;;  %v613_v54 = vld [vmem:[%s3709_s3 + $0x1a8] sm:$0xff] }
  0xf9   : > { %964 = vmatpush2.msra.mxu1 %v518_v55  ;;  %740 = vmatprep.subr.mxu0 %v3413_v3  ;;  %v615_v55 = vld [vmem:[%s3709_s3 + $0x1b8] sm:$0xff] }
  0xfa   : > { %965 = vmatprep.subr.mxu1 %v3413_v3  ;;  %741 = vmatpush2.msra.mxu0 %v485_v56  ;;  %v612_v56 = vld [vmem:[%s3709_s3 + $0x1a0] sm:$0xff] }
  0xfb   : > { %966 = vmatpush2.msra.mxu1 %v517_v57  ;;  %742 = vmatprep.subr.mxu0 %v3413_v3  ;;  %v614_v57 = vld [vmem:[%s3709_s3 + $0x1b0] sm:$0xff] }
  0xfc   : > { %967 = vmatprep.subr.mxu1 %v3413_v3  ;;  %743 = vmatpush2.msra.mxu0 %v484_v58  ;;  %v617_v58 = vld [vmem:[%s3709_s3 + $0x1c8] sm:$0xff] }
  0xfd   : > { %968 = vmatpush2.msra.mxu1 %v516_v59  ;;  %744 = vmatprep.subr.mxu0 %v3413_v3  ;;  %v619_v59 = vld [vmem:[%s3709_s3 + $0x1d8] sm:$0xff] }
  0xfe   : > { %969 = vmatprep.subr.mxu1 %v3413_v3  ;;  %745 = vmatpush2.msra.mxu0 %v483_v60  ;;  %v616_v60 = vld [vmem:[%s3709_s3 + $0x1c0] sm:$0xff] }
  0xff   : > { %970 = vmatpush2.msra.mxu1 %v515_v61  ;;  %746 = vmatprep.subr.mxu0 %v3413_v3  ;;  %v618_v61 = vld [vmem:[%s3709_s3 + $0x1d0] sm:$0xff] }
 0x100   : > { %971 = vmatprep.subr.mxu1 %v3413_v3  ;;  %747 = vmatpush2.msra.mxu0 %v482_v62  ;;  %v621_v62 = vld [vmem:[%s3709_s3 + $0x1e8] sm:$0xff] }
 0x101   : > { %972 = vmatpush2.msra.mxu1 %v514_v63  ;;  %748 = vmatprep.subr.mxu0 %v3413_v3  ;;  %v623_v63 = vld [vmem:[%s3709_s3 + $0x1f8] sm:$0xff] }
 0x102   : > { %973 = vmatprep.subr.mxu1 %v3413_v3  ;;  %749 = vmatpush2.msra.mxu0 %v481_v0  ;;  %v620_v0 = vld [vmem:[%s3709_s3 + $0x1e0] sm:$0xff] }
 0x103   : > { %974 = vmatpush2.msra.mxu1 %v513_v1  ;;  %750 = vmatprep.subr.mxu0 %v3413_v3  ;;  %v622_v1 = vld [vmem:[%s3709_s3 + $0x1f0] sm:$0xff] }
 0x104   : > { %975 = vmatprep.subr.mxu1 %v3413_v3  ;;  %751 = vmatpush2.msra.mxu0 %v480_v2  ;;  %v568_v3 = vld [vmem:[%s3709_s3 + $0x40] sm:$0xff]  ;;  %v625_v2 = vld [vmem:[%s3709_s3 + $0x208] sm:$0xff] }
 0x105   : > { %976 = vmatpush2.msra.mxu1 %v512_v4  ;;  %753 = vmatmul.mubr.f32.vlgmr.msra.gmra.mxu0 %v560_v5  ;;  %v627_v4 = vld [vmem:[%s3709_s3 + $0x218] sm:$0xff]  ;;  %v624_v5 = vld [vmem:[%s3709_s3 + $0x200] sm:$0xff] }
 0x106   : > { %978 = vmatmul.mubr.f32.vlgmr.msra.gmra.mxu1 %v562_v6  ;;  %757 = vmatprep.mubr.f32.mxu0 %v565_v7  ;;  %v626_v6 = vld [vmem:[%s3709_s3 + $0x210] sm:$0xff]  ;;  %v629_v7 = vld [vmem:[%s3709_s3 + $0x228] sm:$0xff] }
 0x107   : > { %982 = vmatprep.mubr.f32.mxu1 %v567_v8  ;;  %v631_v8 = vld [vmem:[%s3709_s3 + $0x238] sm:$0xff] }
 0x109   : > { %758 = vmatmul.mubr.f32.gmra.mxu0 %v564_v9  ;;  %v628_v9 = vld [vmem:[%s3709_s3 + $0x220] sm:$0xff] }
 0x10a   : > { %983 = vmatmul.mubr.f32.gmra.mxu1 %v566_v10  ;;  %762 = vmatprep.mubr.f32.mxu0 %v569_v11  ;;  %v630_v10 = vld [vmem:[%s3709_s3 + $0x230] sm:$0xff]  ;;  %v633_v11 = vld [vmem:[%s3709_s3 + $0x248] sm:$0xff] }
 0x10b   : > { %987 = vmatprep.mubr.f32.mxu1 %v571_v12  ;;  %v635_v12 = vld [vmem:[%s3709_s3 + $0x258] sm:$0xff] }
 0x10d   : > { %763 = vmatmul.mubr.f32.gmra.mxu0 %v568_v3  ;;  %v632_v3 = vld [vmem:[%s3709_s3 + $0x240] sm:$0xff] }
 0x10e   : > { %988 = vmatmul.mubr.f32.gmra.mxu1 %v570_v13  ;;  %767 = vmatprep.mubr.f32.mxu0 %v573_v14  ;;  %v634_v13 = vld [vmem:[%s3709_s3 + $0x250] sm:$0xff]  ;;  %v637_v14 = vld [vmem:[%s3709_s3 + $0x268] sm:$0xff] }
 0x10f   : > { %992 = vmatprep.mubr.f32.mxu1 %v575_v15  ;;  %v639_v15 = vld [vmem:[%s3709_s3 + $0x278] sm:$0xff] }
 0x111   : > { %768 = vmatmul.mubr.f32.gmra.mxu0 %v572_v16  ;;  %v636_v16 = vld [vmem:[%s3709_s3 + $0x260] sm:$0xff] }
 0x112   : > { %993 = vmatmul.mubr.f32.gmra.mxu1 %v574_v17  ;;  %772 = vmatprep.mubr.f32.mxu0 %v577_v18  ;;  %v638_v17 = vld [vmem:[%s3709_s3 + $0x270] sm:$0xff]  ;;  %v641_v18 = vld [vmem:[%s3709_s3 + $0x288] sm:$0xff] }
 0x113   : > { %997 = vmatprep.mubr.f32.mxu1 %v579_v19  ;;  %v643_v19 = vld [vmem:[%s3709_s3 + $0x298] sm:$0xff] }
 0x115   : > { %773 = vmatmul.mubr.f32.gmra.mxu0 %v576_v20  ;;  %v640_v20 = vld [vmem:[%s3709_s3 + $0x280] sm:$0xff] }
 0x116   : > { %998 = vmatmul.mubr.f32.gmra.mxu1 %v578_v21  ;;  %777 = vmatprep.mubr.f32.mxu0 %v581_v22  ;;  %v642_v21 = vld [vmem:[%s3709_s3 + $0x290] sm:$0xff]  ;;  %v645_v22 = vld [vmem:[%s3709_s3 + $0x2a8] sm:$0xff] }
 0x117   : > { %1002 = vmatprep.mubr.f32.mxu1 %v583_v23  ;;  %v647_v23 = vld [vmem:[%s3709_s3 + $0x2b8] sm:$0xff] }
 0x119   : > { %778 = vmatmul.mubr.f32.gmra.mxu0 %v580_v24  ;;  %v644_v24 = vld [vmem:[%s3709_s3 + $0x2a0] sm:$0xff] }
 0x11a   : > { %1003 = vmatmul.mubr.f32.gmra.mxu1 %v582_v25  ;;  %782 = vmatprep.mubr.f32.mxu0 %v585_v26  ;;  %v646_v25 = vld [vmem:[%s3709_s3 + $0x2b0] sm:$0xff]  ;;  %v649_v26 = vld [vmem:[%s3709_s3 + $0x2c8] sm:$0xff] }
 0x11b   : > { %1007 = vmatprep.mubr.f32.mxu1 %v587_v27  ;;  %v651_v27 = vld [vmem:[%s3709_s3 + $0x2d8] sm:$0xff] }
 0x11d   : > { %783 = vmatmul.mubr.f32.gmra.mxu0 %v584_v28  ;;  %v648_v28 = vld [vmem:[%s3709_s3 + $0x2c0] sm:$0xff] }
 0x11e   : > { %1008 = vmatmul.mubr.f32.gmra.mxu1 %v586_v29  ;;  %787 = vmatprep.mubr.f32.mxu0 %v589_v30  ;;  %v650_v29 = vld [vmem:[%s3709_s3 + $0x2d0] sm:$0xff]  ;;  %v653_v30 = vld [vmem:[%s3709_s3 + $0x2e8] sm:$0xff] }
 0x11f   : > { %1012 = vmatprep.mubr.f32.mxu1 %v591_v31  ;;  %v655_v31 = vld [vmem:[%s3709_s3 + $0x2f8] sm:$0xff] }
 0x121   : > { %788 = vmatmul.mubr.f32.gmra.mxu0 %v588_v32  ;;  %v652_v32 = vld [vmem:[%s3709_s3 + $0x2e0] sm:$0xff] }
 0x122   : > { %1013 = vmatmul.mubr.f32.gmra.mxu1 %v590_v33  ;;  %792 = vmatprep.mubr.f32.mxu0 %v593_v34  ;;  %v654_v33 = vld [vmem:[%s3709_s3 + $0x2f0] sm:$0xff]  ;;  %v657_v34 = vld [vmem:[%s3709_s3 + $0x308] sm:$0xff] }
 0x123   : > { %1017 = vmatprep.mubr.f32.mxu1 %v595_v35  ;;  %v659_v35 = vld [vmem:[%s3709_s3 + $0x318] sm:$0xff] }
 0x125   : > { %793 = vmatmul.mubr.f32.gmra.mxu0 %v592_v36  ;;  %v656_v36 = vld [vmem:[%s3709_s3 + $0x300] sm:$0xff] }
 0x126   : > { %1018 = vmatmul.mubr.f32.gmra.mxu1 %v594_v37  ;;  %797 = vmatprep.mubr.f32.mxu0 %v597_v38  ;;  %v658_v37 = vld [vmem:[%s3709_s3 + $0x310] sm:$0xff]  ;;  %v661_v38 = vld [vmem:[%s3709_s3 + $0x328] sm:$0xff] }
 0x127   : > { %1022 = vmatprep.mubr.f32.mxu1 %v599_v39  ;;  %v663_v39 = vld [vmem:[%s3709_s3 + $0x338] sm:$0xff] }
 0x129   : > { %798 = vmatmul.mubr.f32.gmra.mxu0 %v596_v40  ;;  %v660_v40 = vld [vmem:[%s3709_s3 + $0x320] sm:$0xff] }
 0x12a   : > { %1023 = vmatmul.mubr.f32.gmra.mxu1 %v598_v41  ;;  %802 = vmatprep.mubr.f32.mxu0 %v601_v42  ;;  %v662_v41 = vld [vmem:[%s3709_s3 + $0x330] sm:$0xff]  ;;  %v665_v42 = vld [vmem:[%s3709_s3 + $0x348] sm:$0xff] }
 0x12b   : > { %1027 = vmatprep.mubr.f32.mxu1 %v603_v43  ;;  %v667_v43 = vld [vmem:[%s3709_s3 + $0x358] sm:$0xff] }
 0x12d   : > { %803 = vmatmul.mubr.f32.gmra.mxu0 %v600_v44  ;;  %v664_v44 = vld [vmem:[%s3709_s3 + $0x340] sm:$0xff] }
 0x12e   : > { %1028 = vmatmul.mubr.f32.gmra.mxu1 %v602_v45  ;;  %807 = vmatprep.mubr.f32.mxu0 %v605_v46  ;;  %v666_v45 = vld [vmem:[%s3709_s3 + $0x350] sm:$0xff]  ;;  %v669_v46 = vld [vmem:[%s3709_s3 + $0x368] sm:$0xff] }
 0x12f   : > { %1032 = vmatprep.mubr.f32.mxu1 %v607_v47  ;;  %v671_v47 = vld [vmem:[%s3709_s3 + $0x378] sm:$0xff] }
 0x131   : > { %808 = vmatmul.mubr.f32.gmra.mxu0 %v604_v48  ;;  %v668_v48 = vld [vmem:[%s3709_s3 + $0x360] sm:$0xff] }
 0x132   : > { %1033 = vmatmul.mubr.f32.gmra.mxu1 %v606_v49  ;;  %812 = vmatprep.mubr.f32.mxu0 %v609_v50  ;;  %v670_v49 = vld [vmem:[%s3709_s3 + $0x370] sm:$0xff]  ;;  %v673_v50 = vld [vmem:[%s3709_s3 + $0x388] sm:$0xff] }
 0x133   : > { %1037 = vmatprep.mubr.f32.mxu1 %v611_v51  ;;  %v675_v51 = vld [vmem:[%s3709_s3 + $0x398] sm:$0xff] }
 0x135   : > { %813 = vmatmul.mubr.f32.gmra.mxu0 %v608_v52  ;;  %v672_v52 = vld [vmem:[%s3709_s3 + $0x380] sm:$0xff] }
 0x136   : > { %1038 = vmatmul.mubr.f32.gmra.mxu1 %v610_v53  ;;  %817 = vmatprep.mubr.f32.mxu0 %v613_v54  ;;  %v674_v53 = vld [vmem:[%s3709_s3 + $0x390] sm:$0xff]  ;;  %v677_v54 = vld [vmem:[%s3709_s3 + $0x3a8] sm:$0xff] }
 0x137   : > { %1042 = vmatprep.mubr.f32.mxu1 %v615_v55  ;;  %v679_v55 = vld [vmem:[%s3709_s3 + $0x3b8] sm:$0xff] }
 0x139   : > { %818 = vmatmul.mubr.f32.gmra.mxu0 %v612_v56  ;;  %v676_v56 = vld [vmem:[%s3709_s3 + $0x3a0] sm:$0xff] }
 0x13a   : > { %1043 = vmatmul.mubr.f32.gmra.mxu1 %v614_v57  ;;  %822 = vmatprep.mubr.f32.mxu0 %v617_v58  ;;  %v678_v57 = vld [vmem:[%s3709_s3 + $0x3b0] sm:$0xff]  ;;  %v681_v58 = vld [vmem:[%s3709_s3 + $0x3c8] sm:$0xff] }
 0x13b   : > { %1047 = vmatprep.mubr.f32.mxu1 %v619_v59  ;;  %v683_v59 = vld [vmem:[%s3709_s3 + $0x3d8] sm:$0xff] }
 0x13d   : > { %823 = vmatmul.mubr.f32.gmra.mxu0 %v616_v60  ;;  %v680_v60 = vld [vmem:[%s3709_s3 + $0x3c0] sm:$0xff] }
 0x13e   : > { %1048 = vmatmul.mubr.f32.gmra.mxu1 %v618_v61  ;;  %827 = vmatprep.mubr.f32.mxu0 %v621_v62  ;;  %v682_v61 = vld [vmem:[%s3709_s3 + $0x3d0] sm:$0xff]  ;;  %v685_v62 = vld [vmem:[%s3709_s3 + $0x3e8] sm:$0xff] }
 0x13f   : > { %1052 = vmatprep.mubr.f32.mxu1 %v623_v63  ;;  %v687_v63 = vld [vmem:[%s3709_s3 + $0x3f8] sm:$0xff] }
 0x141   : > { %828 = vmatmul.mubr.f32.gmra.mxu0 %v620_v0  ;;  %v684_v0 = vld [vmem:[%s3709_s3 + $0x3e0] sm:$0xff] }
 0x142   : > { %1053 = vmatmul.mubr.f32.gmra.mxu1 %v622_v1  ;;  %832 = vmatprep.mubr.f32.mxu0 %v625_v2  ;;  %v686_v1 = vld [vmem:[%s3709_s3 + $0x3f0] sm:$0xff] }
 0x143   : > { %1057 = vmatprep.mubr.f32.mxu1 %v627_v4  ;;  %v528_v4 = vld [vmem:[#allocation2 + $0xb0] sm:$0xff] }
 0x145   : > { %833 = vmatmul.mubr.f32.gmra.mxu0 %v624_v5 }
 0x146   : > { %1058 = vmatmul.mubr.f32.gmra.mxu1 %v626_v6  ;;  %837 = vmatprep.mubr.f32.mxu0 %v629_v7 }
 0x147   : > { %1062 = vmatprep.mubr.f32.mxu1 %v631_v8 }
 0x149   : > { %838 = vmatmul.mubr.f32.gmra.mxu0 %v628_v9 }
 0x14a   : > { %1063 = vmatmul.mubr.f32.gmra.mxu1 %v630_v10  ;;  %842 = vmatprep.mubr.f32.mxu0 %v633_v11  ;;  %v529_v11 = vld [vmem:[#allocation2] sm:$0xff] }
 0x14b   : > { %1067 = vmatprep.mubr.f32.mxu1 %v635_v12 }
 0x14d   : > { %843 = vmatmul.mubr.f32.gmra.mxu0 %v632_v3 }
 0x14e   : > { %1068 = vmatmul.mubr.f32.gmra.mxu1 %v634_v13  ;;  %847 = vmatprep.mubr.f32.mxu0 %v637_v14 }
 0x14f   : > { %1072 = vmatprep.mubr.f32.mxu1 %v639_v15 }
 0x151   : > { %848 = vmatmul.mubr.f32.gmra.mxu0 %v636_v16 }
 0x152   : > { %1073 = vmatmul.mubr.f32.gmra.mxu1 %v638_v17  ;;  %852 = vmatprep.mubr.f32.mxu0 %v641_v18  ;;  %v530_v17 = vld [vmem:[#allocation2 + $0xd8] sm:$0xff] }
 0x153   : > { %1077 = vmatprep.mubr.f32.mxu1 %v643_v19 }
 0x155   : > { %853 = vmatmul.mubr.f32.gmra.mxu0 %v640_v20 }
 0x156   : > { %1078 = vmatmul.mubr.f32.gmra.mxu1 %v642_v21  ;;  %857 = vmatprep.mubr.f32.mxu0 %v645_v22 }
 0x157   : > { %1082 = vmatprep.mubr.f32.mxu1 %v647_v23 }
 0x159   : > { %858 = vmatmul.mubr.f32.gmra.mxu0 %v644_v24  ;;  %v531_v24 = vld [vmem:[#allocation2 + $0x18] sm:$0xff] }
 0x15a   : > { %1083 = vmatmul.mubr.f32.gmra.mxu1 %v646_v25  ;;  %862 = vmatprep.mubr.f32.mxu0 %v649_v26 }
 0x15b   : > { %1087 = vmatprep.mubr.f32.mxu1 %v651_v27 }
 0x15d   : > { %863 = vmatmul.mubr.f32.gmra.mxu0 %v648_v28 }
 0x15e   : > { %1088 = vmatmul.mubr.f32.gmra.mxu1 %v650_v29  ;;  %867 = vmatprep.mubr.f32.mxu0 %v653_v30 }
 0x15f   : > { %1092 = vmatprep.mubr.f32.mxu1 %v655_v31  ;;  %v532_v31 = vld [vmem:[#allocation2 + $0x50] sm:$0xff] }
 0x161   : > { %868 = vmatmul.mubr.f32.gmra.mxu0 %v652_v32 }
 0x162   : > { %1093 = vmatmul.mubr.f32.gmra.mxu1 %v654_v33  ;;  %872 = vmatprep.mubr.f32.mxu0 %v657_v34 }
 0x163   : > { %1097 = vmatprep.mubr.f32.mxu1 %v659_v35 }
 0x165   : > { %873 = vmatmul.mubr.f32.gmra.mxu0 %v656_v36 }
 0x166   : > { %1098 = vmatmul.mubr.f32.gmra.mxu1 %v658_v37  ;;  %877 = vmatprep.mubr.f32.mxu0 %v661_v38  ;;  %v533_v38 = vld [vmem:[#allocation2 + $0x68] sm:$0xff] }
 0x167   : > { %1102 = vmatprep.mubr.f32.mxu1 %v663_v39 }
 0x169   : > { %878 = vmatmul.mubr.f32.gmra.mxu0 %v660_v40 }
 0x16a   : > { %1103 = vmatmul.mubr.f32.gmra.mxu1 %v662_v41  ;;  %882 = vmatprep.mubr.f32.mxu0 %v665_v42 }
 0x16b   : > { %1107 = vmatprep.mubr.f32.mxu1 %v667_v43 }
 0x16d   : > { %883 = vmatmul.mubr.f32.gmra.mxu0 %v664_v44 }
 0x16e   : > { %1108 = vmatmul.mubr.f32.gmra.mxu1 %v666_v45  ;;  %887 = vmatprep.mubr.f32.mxu0 %v669_v46  ;;  %v534_v45 = vld [vmem:[#allocation2 + $0x30] sm:$0xff] }
 0x16f   : > { %1112 = vmatprep.mubr.f32.mxu1 %v671_v47 }
 0x171   : > { %888 = vmatmul.mubr.f32.gmra.mxu0 %v668_v48 }
 0x172   : > { %1113 = vmatmul.mubr.f32.gmra.mxu1 %v670_v49  ;;  %892 = vmatprep.mubr.f32.mxu0 %v673_v50 }
 0x173   : > { %1117 = vmatprep.mubr.f32.mxu1 %v675_v51 }
 0x175   : > { %893 = vmatmul.mubr.f32.gmra.mxu0 %v672_v52  ;;  %v535_v52 = vld [vmem:[#allocation2 + $0x48] sm:$0xff] }
 0x176   : > { %1118 = vmatmul.mubr.f32.gmra.mxu1 %v674_v53  ;;  %897 = vmatprep.mubr.f32.mxu0 %v677_v54 }
 0x177   : > { %1122 = vmatprep.mubr.f32.mxu1 %v679_v55 }
 0x179   : > { %898 = vmatmul.mubr.f32.gmra.mxu0 %v676_v56 }
 0x17a   : > { %1123 = vmatmul.mubr.f32.gmra.mxu1 %v678_v57  ;;  %902 = vmatprep.mubr.f32.mxu0 %v681_v58 }
 0x17b   : > { %1127 = vmatprep.mubr.f32.mxu1 %v683_v59  ;;  %v536_v59 = vld [vmem:[#allocation2 + $0x80] sm:$0xff] }
 0x17d   : > { %903 = vmatmul.mubr.f32.gmra.mxu0 %v680_v60 }
 0x17e   : > { %1128 = vmatmul.mubr.f32.gmra.mxu1 %v682_v61  ;;  %907 = vmatprep.mubr.f32.mxu0 %v685_v62 }
 0x17f   : > { %1132 = vmatprep.mubr.f32.mxu1 %v687_v63 }
 0x181   : > { %908 = vmatmul.mubr.f32.gmra.mxu0 %v684_v0 }
 0x182   : > { %1133 = vmatmul.mubr.f32.gmra.mxu1 %v686_v1 }
 0x1c5   : > { %v754_v2 = vpop.f32.mrf.mxu0 }
 0x1c6   : > { %v979_v5 = vpop.f32.mrf.mxu1 }
 0x1c7   : > { %v980_v6 = vadd.f32 %v979_v5, %v754_v2  ;;  %v756_v7 = vpop.f32.mrf.mxu0  ;;  %v537_v2 = vld [vmem:[#allocation2 + $0x88] sm:$0xff] }
 0x1c8   : > { %v981_v8 = vpop.f32.mrf.mxu1 }
 0x1c9   : > { %v1138_v9 = vadd.f32 %v980_v6, %v528_v4  ;;  %v759_v10 = vpop.f32.mrf.mxu0 }
 0x1ca   : > { %v984_v12 = vpop.f32.mrf.mxu1 }
 0x1cb   : > { %1170 = vst [vmem:[#allocation2 + $0xb0] sm:$0xff] %v1138_v9  ;;  %v985_v3 = vadd.f32 %v984_v12, %v759_v10  ;;  %v761_v13 = vpop.f32.mrf.mxu0  ;;  %v538_v10 = vld [vmem:[#allocation2 + $0xe8] sm:$0xff] }
 0x1cc   : > { %v986_v14 = vpop.f32.mrf.mxu1 }
 0x1cd   : > { %v1139_v15 = vadd.f32 %v985_v3, %v529_v11  ;;  %v764_v16 = vpop.f32.mrf.mxu0 }
 0x1ce   : > { %v989_v18 = vpop.f32.mrf.mxu1 }
 0x1cf   : > { %1171 = vst [vmem:[#allocation2] sm:$0xff] %v1139_v15  ;;  %v990_v19 = vadd.f32 %v989_v18, %v764_v16  ;;  %v766_v20 = vpop.f32.mrf.mxu0  ;;  %v539_v16 = vld [vmem:[#allocation2 + $0xb8] sm:$0xff] }
 0x1d0   : > { %v991_v21 = vpop.f32.mrf.mxu1 }
 0x1d1   : > { %v1140_v22 = vadd.f32 %v990_v19, %v530_v17  ;;  %v769_v23 = vpop.f32.mrf.mxu0 }
 0x1d2   : > { %v994_v25 = vpop.f32.mrf.mxu1 }
 0x1d3   : > { %1172 = vst [vmem:[#allocation2 + $0xd8] sm:$0xff] %v1140_v22  ;;  %v995_v26 = vadd.f32 %v994_v25, %v769_v23  ;;  %v771_v27 = vpop.f32.mrf.mxu0  ;;  %v540_v23 = vld [vmem:[#allocation2 + $0x60] sm:$0xff] }
 0x1d4   : > { %v996_v28 = vpop.f32.mrf.mxu1 }
 0x1d5   : > { %v1141_v29 = vadd.f32 %v995_v26, %v531_v24  ;;  %v774_v30 = vpop.f32.mrf.mxu0 }
 0x1d6   : > { %v999_v32 = vpop.f32.mrf.mxu1 }
 0x1d7   : > { %1173 = vst [vmem:[#allocation2 + $0x18] sm:$0xff] %v1141_v29  ;;  %v1000_v33 = vadd.f32 %v999_v32, %v774_v30  ;;  %v776_v34 = vpop.f32.mrf.mxu0  ;;  %v541_v30 = vld [vmem:[#allocation2 + $0xf0] sm:$0xff] }
 0x1d8   : > { %v1001_v35 = vpop.f32.mrf.mxu1 }
 0x1d9   : > { %v1142_v36 = vadd.f32 %v1000_v33, %v532_v31  ;;  %v779_v37 = vpop.f32.mrf.mxu0 }
 0x1da   : > { %v1004_v39 = vpop.f32.mrf.mxu1 }
 0x1db   : > { %1174 = vst [vmem:[#allocation2 + $0x50] sm:$0xff] %v1142_v36  ;;  %v1005_v40 = vadd.f32 %v1004_v39, %v779_v37  ;;  %v781_v41 = vpop.f32.mrf.mxu0  ;;  %v542_v37 = vld [vmem:[#allocation2 + $0x8] sm:$0xff] }
 0x1dc   : > { %v1006_v42 = vpop.f32.mrf.mxu1 }
 0x1dd   : > { %v1143_v43 = vadd.f32 %v1005_v40, %v533_v38  ;;  %v784_v44 = vpop.f32.mrf.mxu0 }
 0x1de   : > { %v1009_v46 = vpop.f32.mrf.mxu1 }
 0x1df   : > { %1175 = vst [vmem:[#allocation2 + $0x68] sm:$0xff] %v1143_v43  ;;  %v1010_v47 = vadd.f32 %v1009_v46, %v784_v44  ;;  %v786_v48 = vpop.f32.mrf.mxu0  ;;  %v543_v44 = vld [vmem:[#allocation2 + $0x78] sm:$0xff] }
 0x1e0   : > { %v1011_v49 = vpop.f32.mrf.mxu1 }
 0x1e1   : > { %v1144_v50 = vadd.f32 %v1010_v47, %v534_v45  ;;  %v789_v51 = vpop.f32.mrf.mxu0 }
 0x1e2   : > { %v1014_v53 = vpop.f32.mrf.mxu1 }
 0x1e3   : > { %1176 = vst [vmem:[#allocation2 + $0x30] sm:$0xff] %v1144_v50  ;;  %v1015_v54 = vadd.f32 %v1014_v53, %v789_v51  ;;  %v791_v55 = vpop.f32.mrf.mxu0  ;;  %v544_v51 = vld [vmem:[#allocation2 + $0x38] sm:$0xff] }
 0x1e4   : > { %v1016_v56 = vpop.f32.mrf.mxu1 }
 0x1e5   : > { %v1145_v57 = vadd.f32 %v1015_v54, %v535_v52  ;;  %v794_v58 = vpop.f32.mrf.mxu0 }
 0x1e6   : > { %v1019_v60 = vpop.f32.mrf.mxu1 }
 0x1e7   : > { %1177 = vst [vmem:[#allocation2 + $0x48] sm:$0xff] %v1145_v57  ;;  %v1020_v61 = vadd.f32 %v1019_v60, %v794_v58  ;;  %v796_v62 = vpop.f32.mrf.mxu0  ;;  %v545_v58 = vld [vmem:[#allocation2 + $0x58] sm:$0xff] }
 0x1e8   : > { %v1021_v63 = vpop.f32.mrf.mxu1 }
 0x1e9   : > { %v1146_v0 = vadd.f32 %v1020_v61, %v536_v59  ;;  %v799_v1 = vpop.f32.mrf.mxu0 }
 0x1ea   : > { %v1024_v4 = vpop.f32.mrf.mxu1 }
 0x1eb   : > { %1178 = vst [vmem:[#allocation2 + $0x80] sm:$0xff] %v1146_v0  ;;  %v1025_v5 = vadd.f32 %v1024_v4, %v799_v1  ;;  %v801_v6 = vpop.f32.mrf.mxu0  ;;  %v546_v1 = vld [vmem:[#allocation2 + $0x40] sm:$0xff] }
 0x1ec   : > { %v1026_v7 = vpop.f32.mrf.mxu1 }
 0x1ed   : > { %v1147_v8 = vadd.f32 %v1025_v5, %v537_v2  ;;  %v804_v9 = vpop.f32.mrf.mxu0 }
 0x1ee   : > { %v1029_v11 = vpop.f32.mrf.mxu1 }
 0x1ef   : > { %1179 = vst [vmem:[#allocation2 + $0x88] sm:$0xff] %v1147_v8  ;;  %v1030_v12 = vadd.f32 %v1029_v11, %v804_v9  ;;  %v806_v3 = vpop.f32.mrf.mxu0  ;;  %v547_v9 = vld [vmem:[#allocation2 + $0xc8] sm:$0xff] }
 0x1f0   : > { %v1031_v13 = vpop.f32.mrf.mxu1 }
 0x1f1   : > { %v1148_v14 = vadd.f32 %v1030_v12, %v538_v10  ;;  %v809_v15 = vpop.f32.mrf.mxu0 }
 0x1f2   : > { %v1034_v17 = vpop.f32.mrf.mxu1 }
 0x1f3   : > { %1180 = vst [vmem:[#allocation2 + $0xe8] sm:$0xff] %v1148_v14  ;;  %v1035_v18 = vadd.f32 %v1034_v17, %v809_v15  ;;  %v811_v19 = vpop.f32.mrf.mxu0  ;;  %v548_v15 = vld [vmem:[#allocation2 + $0xe0] sm:$0xff] }
 0x1f4   : > { %v1036_v20 = vpop.f32.mrf.mxu1 }
 0x1f5   : > { %v1149_v21 = vadd.f32 %v1035_v18, %v539_v16  ;;  %v814_v22 = vpop.f32.mrf.mxu0 }
 0x1f6   : > { %v1039_v24 = vpop.f32.mrf.mxu1 }
 0x1f7   : > { %1181 = vst [vmem:[#allocation2 + $0xb8] sm:$0xff] %v1149_v21  ;;  %v1040_v25 = vadd.f32 %v1039_v24, %v814_v22  ;;  %v816_v26 = vpop.f32.mrf.mxu0  ;;  %v549_v22 = vld [vmem:[#allocation2 + $0x90] sm:$0xff] }
 0x1f8   : > { %v1041_v27 = vpop.f32.mrf.mxu1 }
 0x1f9   : > { %v1150_v28 = vadd.f32 %v1040_v25, %v540_v23  ;;  %v819_v29 = vpop.f32.mrf.mxu0 }
 0x1fa   : > { %v1044_v31 = vpop.f32.mrf.mxu1 }
 0x1fb   : > { %1182 = vst [vmem:[#allocation2 + $0x60] sm:$0xff] %v1150_v28  ;;  %v1045_v32 = vadd.f32 %v1044_v31, %v819_v29  ;;  %v821_v33 = vpop.f32.mrf.mxu0  ;;  %v550_v29 = vld [vmem:[#allocation2 + $0x70] sm:$0xff] }
 0x1fc   : > { %v1046_v34 = vpop.f32.mrf.mxu1 }
 0x1fd   : > { %v1151_v35 = vadd.f32 %v1045_v32, %v541_v30  ;;  %v824_v36 = vpop.f32.mrf.mxu0 }
 0x1fe   : > { %v1049_v38 = vpop.f32.mrf.mxu1 }
 0x1ff   : > { %1183 = vst [vmem:[#allocation2 + $0xf0] sm:$0xff] %v1151_v35  ;;  %v1050_v39 = vadd.f32 %v1049_v38, %v824_v36  ;;  %v826_v40 = vpop.f32.mrf.mxu0  ;;  %v551_v36 = vld [vmem:[#allocation2 + $0xc0] sm:$0xff] }
 0x200   : > { %v1051_v41 = vpop.f32.mrf.mxu1 }
 0x201   : > { %v1152_v42 = vadd.f32 %v1050_v39, %v542_v37  ;;  %v829_v43 = vpop.f32.mrf.mxu0 }
 0x202   : > { %v1054_v45 = vpop.f32.mrf.mxu1 }
 0x203   : > { %1184 = vst [vmem:[#allocation2 + $0x8] sm:$0xff] %v1152_v42  ;;  %v1055_v46 = vadd.f32 %v1054_v45, %v829_v43  ;;  %v831_v47 = vpop.f32.mrf.mxu0  ;;  %v552_v43 = vld [vmem:[#allocation2 + $0xa8] sm:$0xff] }
 0x204   : > { %v1056_v48 = vpop.f32.mrf.mxu1 }
 0x205   : > { %v1153_v49 = vadd.f32 %v1055_v46, %v543_v44  ;;  %v834_v50 = vpop.f32.mrf.mxu0 }
 0x206   : > { %v1059_v52 = vpop.f32.mrf.mxu1 }
 0x207   : > { %1185 = vst [vmem:[#allocation2 + $0x78] sm:$0xff] %v1153_v49  ;;  %v1060_v53 = vadd.f32 %v1059_v52, %v834_v50  ;;  %v836_v54 = vpop.f32.mrf.mxu0  ;;  %v553_v50 = vld [vmem:[#allocation2 + $0xd0] sm:$0xff] }
 0x208   : > { %v1061_v55 = vpop.f32.mrf.mxu1 }
 0x209   : > { %v1154_v56 = vadd.f32 %v1060_v53, %v544_v51  ;;  %v839_v57 = vpop.f32.mrf.mxu0 }
 0x20a   : > { %v1064_v59 = vpop.f32.mrf.mxu1 }
 0x20b   : > { %1186 = vst [vmem:[#allocation2 + $0x38] sm:$0xff] %v1154_v56  ;;  %v1065_v60 = vadd.f32 %v1064_v59, %v839_v57  ;;  %v841_v61 = vpop.f32.mrf.mxu0  ;;  %v554_v57 = vld [vmem:[#allocation2 + $0x10] sm:$0xff] }
 0x20c   : > { %v1066_v62 = vpop.f32.mrf.mxu1 }
 0x20d   : > { %v1155_v63 = vadd.f32 %v1065_v60, %v545_v58  ;;  %v844_v0 = vpop.f32.mrf.mxu0 }
 0x20e   : > { %v1069_v2 = vpop.f32.mrf.mxu1 }
 0x20f   : > { %1187 = vst [vmem:[#allocation2 + $0x58] sm:$0xff] %v1155_v63  ;;  %v1070_v4 = vadd.f32 %v1069_v2, %v844_v0  ;;  %v846_v5 = vpop.f32.mrf.mxu0  ;;  %v555_v0 = vld [vmem:[#allocation2 + $0x28] sm:$0xff] }
 0x210   : > { %v1071_v6 = vpop.f32.mrf.mxu1 }
 0x211   : > { %v1156_v7 = vadd.f32 %v1070_v4, %v546_v1  ;;  %v849_v8 = vpop.f32.mrf.mxu0 }
 0x212   : > { %v1074_v10 = vpop.f32.mrf.mxu1 }
 0x213   : > { %1188 = vst [vmem:[#allocation2 + $0x40] sm:$0xff] %v1156_v7  ;;  %v1075_v11 = vadd.f32 %v1074_v10, %v849_v8  ;;  %v851_v12 = vpop.f32.mrf.mxu0  ;;  %v556_v8 = vld [vmem:[#allocation2 + $0xa0] sm:$0xff] }
 0x214   : > { %v1076_v3 = vpop.f32.mrf.mxu1 }
 0x215   : > { %v1157_v13 = vadd.f32 %v1075_v11, %v547_v9  ;;  %v854_v14 = vpop.f32.mrf.mxu0 }
 0x216   : > { %v1079_v16 = vpop.f32.mrf.mxu1 }
 0x217   : > { %1189 = vst [vmem:[#allocation2 + $0xc8] sm:$0xff] %v1157_v13  ;;  %v1080_v17 = vadd.f32 %v1079_v16, %v854_v14  ;;  %v856_v18 = vpop.f32.mrf.mxu0  ;;  %v557_v14 = vld [vmem:[#allocation2 + $0xf8] sm:$0xff] }
 0x218   : > { %v1081_v19 = vpop.f32.mrf.mxu1 }
 0x219   : > { %v1158_v20 = vadd.f32 %v1080_v17, %v548_v15  ;;  %v859_v21 = vpop.f32.mrf.mxu0 }
 0x21a   : > { %v1084_v23 = vpop.f32.mrf.mxu1 }
 0x21b   : > { %1190 = vst [vmem:[#allocation2 + $0xe0] sm:$0xff] %v1158_v20  ;;  %v1085_v24 = vadd.f32 %v1084_v23, %v859_v21  ;;  %v861_v25 = vpop.f32.mrf.mxu0  ;;  %v558_v21 = vld [vmem:[#allocation2 + $0x20] sm:$0xff] }
 0x21c   : > { %v1086_v26 = vpop.f32.mrf.mxu1 }
 0x21d   : > { %v1159_v27 = vadd.f32 %v1085_v24, %v549_v22  ;;  %v864_v28 = vpop.f32.mrf.mxu0 }
 0x21e   : > { %v1089_v30 = vpop.f32.mrf.mxu1 }
 0x21f   : > { %1191 = vst [vmem:[#allocation2 + $0x90] sm:$0xff] %v1159_v27  ;;  %v1090_v31 = vadd.f32 %v1089_v30, %v864_v28  ;;  %v866_v32 = vpop.f32.mrf.mxu0  ;;  %v559_v28 = vld [vmem:[#allocation2 + $0x98] sm:$0xff] }
 0x220   : > { %v1091_v33 = vpop.f32.mrf.mxu1 }
 0x221   : > { %v1160_v34 = vadd.f32 %v1090_v31, %v550_v29  ;;  %v869_v35 = vpop.f32.mrf.mxu0 }
 0x222   : > { %v1094_v37 = vpop.f32.mrf.mxu1 }
 0x223   : > { %1192 = vst [vmem:[#allocation2 + $0x70] sm:$0xff] %v1160_v34  ;;  %v1095_v38 = vadd.f32 %v1094_v37, %v869_v35  ;;  %v871_v39 = vpop.f32.mrf.mxu0 }
 0x224   : > { %v1096_v40 = vpop.f32.mrf.mxu1 }
 0x225   : > { %v1161_v41 = vadd.f32 %v1095_v38, %v551_v36  ;;  %v874_v42 = vpop.f32.mrf.mxu0 }
 0x226   : > { %v1099_v44 = vpop.f32.mrf.mxu1 }
 0x227   : > { %1193 = vst [vmem:[#allocation2 + $0xc0] sm:$0xff] %v1161_v41  ;;  %v1100_v45 = vadd.f32 %v1099_v44, %v874_v42  ;;  %v876_v46 = vpop.f32.mrf.mxu0 }
 0x228   : > { %v1101_v47 = vpop.f32.mrf.mxu1 }
 0x229   : > { %v1162_v48 = vadd.f32 %v1100_v45, %v552_v43  ;;  %v879_v49 = vpop.f32.mrf.mxu0 }
 0x22a   : > { %v1104_v51 = vpop.f32.mrf.mxu1 }
 0x22b   : > { %1194 = vst [vmem:[#allocation2 + $0xa8] sm:$0xff] %v1162_v48  ;;  %v1105_v52 = vadd.f32 %v1104_v51, %v879_v49  ;;  %v881_v53 = vpop.f32.mrf.mxu0 }
 0x22c   : > { %v1106_v54 = vpop.f32.mrf.mxu1 }
 0x22d   : > { %v1163_v55 = vadd.f32 %v1105_v52, %v553_v50  ;;  %v884_v56 = vpop.f32.mrf.mxu0 }
 0x22e   : > { %v1109_v58 = vpop.f32.mrf.mxu1 }
 0x22f   : > { %1195 = vst [vmem:[#allocation2 + $0xd0] sm:$0xff] %v1163_v55  ;;  %v1110_v59 = vadd.f32 %v1109_v58, %v884_v56  ;;  %v886_v60 = vpop.f32.mrf.mxu0 }
 0x230   : > { %v1111_v61 = vpop.f32.mrf.mxu1 }
 0x231   : > { %v1164_v62 = vadd.f32 %v1110_v59, %v554_v57  ;;  %v889_v63 = vpop.f32.mrf.mxu0 }
 0x232   : > { %v1114_v1 = vpop.f32.mrf.mxu1 }
 0x233   : > { %1196 = vst [vmem:[#allocation2 + $0x10] sm:$0xff] %v1164_v62  ;;  %v1115_v2 = vadd.f32 %v1114_v1, %v889_v63  ;;  %v891_v4 = vpop.f32.mrf.mxu0 }
 0x234   : > { %v1116_v5 = vpop.f32.mrf.mxu1 }
 0x235   : > { %v1165_v6 = vadd.f32 %v1115_v2, %v555_v0  ;;  %v894_v7 = vpop.f32.mrf.mxu0 }
 0x236   : > { %v1119_v9 = vpop.f32.mrf.mxu1 }
 0x237   : > { %1197 = vst [vmem:[#allocation2 + $0x28] sm:$0xff] %v1165_v6  ;;  %v1120_v10 = vadd.f32 %v1119_v9, %v894_v7  ;;  %v896_v11 = vpop.f32.mrf.mxu0 }
 0x238   : > { %v1121_v12 = vpop.f32.mrf.mxu1 }
 0x239   : > { %v1166_v3 = vadd.f32 %v1120_v10, %v556_v8  ;;  %v899_v13 = vpop.f32.mrf.mxu0 }
 0x23a   : > { %v1124_v15 = vpop.f32.mrf.mxu1 }
 0x23b   : > { %1198 = vst [vmem:[#allocation2 + $0xa0] sm:$0xff] %v1166_v3  ;;  %v1125_v16 = vadd.f32 %v1124_v15, %v899_v13  ;;  %v901_v17 = vpop.f32.mrf.mxu0 }
 0x23c   : > { %v1126_v18 = vpop.f32.mrf.mxu1 }
 0x23d   : > { %v1167_v19 = vadd.f32 %v1125_v16, %v557_v14  ;;  %v904_v20 = vpop.f32.mrf.mxu0 }
 0x23e   : > { %v1129_v22 = vpop.f32.mrf.mxu1 }
 0x23f   : > { %1199 = vst [vmem:[#allocation2 + $0xf8] sm:$0xff] %v1167_v19  ;;  %v1130_v23 = vadd.f32 %v1129_v22, %v904_v20  ;;  %v906_v24 = vpop.f32.mrf.mxu0 }
 0x240   : > { %v1131_v25 = vpop.f32.mrf.mxu1 }
 0x241   : > { %v1168_v26 = vadd.f32 %v1130_v23, %v558_v21  ;;  %v909_v27 = vpop.f32.mrf.mxu0 }
 0x242   : > { %v1134_v29 = vpop.f32.mrf.mxu1 }
 0x243   : > { %1200 = vst [vmem:[#allocation2 + $0x20] sm:$0xff] %v1168_v26  ;;  %v1135_v30 = vadd.f32 %v1134_v29, %v909_v27  ;;  %v911_v31 = vpop.f32.mrf.mxu0  ;;  %1205 = sbr.rel (%p2575_p12) target bundleno = 1049 (0x419), region = 84 }
 0x244   : > { %v1136_v32 = vpop.f32.mrf.mxu1 }
 0x245   : > { %v1169_v33 = vadd.f32 %v1135_v30, %v559_v28 }
 0x247   : > { %1201 = vst [vmem:[#allocation2 + $0x98] sm:$0xff] %v1169_v33 }
 0x248   : > { %v1365_v34 = vld [vmem:[#allocation11 + $0x78] sm:$0xff]  ;;  %v1364_v36 = vld [vmem:[#allocation11 + $0x70] sm:$0xff]  ;;  %v1363_v38 = vld [vmem:[#allocation11 + $0x68] sm:$0xff]  ;;  %v3414_v26 = vmov 64  }
 0x249   : > { %v1349_v35 = vld [vmem:[#allocation9 + $0x78] sm:$0xff]  ;;  %2682 = vmatprep.subr.mxu0 %v1365_v34  ;;  %v1348_v37 = vld [vmem:[#allocation9 + $0x70] sm:$0xff]  ;;  %v1347_v39 = vld [vmem:[#allocation9 + $0x68] sm:$0xff]  ;;  %3011 = vset.pattern.permute.xlu1 %v3414_v26 }
 0x24a   : > { %2762 = vmatprep.subr.mxu1 %v1349_v35  ;;  %2683 = vmatpush3.msra.mxu0 %v1365_v34  ;;  %v1362_v40 = vld [vmem:[#allocation11 + $0x60] sm:$0xff]  ;;  %v1361_v42 = vld [vmem:[#allocation11 + $0x58] sm:$0xff]  ;;  %v1360_v44 = vld [vmem:[#allocation11 + $0x50] sm:$0xff] }
 0x24b   : > { %2763 = vmatpush3.msra.mxu1 %v1349_v35  ;;  %2684 = vmatprep.subr.mxu0 %v1364_v36  ;;  %v1346_v41 = vld [vmem:[#allocation9 + $0x60] sm:$0xff]  ;;  %v1345_v43 = vld [vmem:[#allocation9 + $0x58] sm:$0xff]  ;;  %v1344_v45 = vld [vmem:[#allocation9 + $0x50] sm:$0xff] }
 0x24c   : > { %2764 = vmatprep.subr.mxu1 %v1348_v37  ;;  %2685 = vmatpush3.msra.mxu0 %v1364_v36  ;;  %v1359_v46 = vld [vmem:[#allocation11 + $0x48] sm:$0xff]  ;;  %v1358_v48 = vld [vmem:[#allocation11 + $0x40] sm:$0xff]  ;;  %v1357_v50 = vld [vmem:[#allocation11 + $0x38] sm:$0xff] }
 0x24d   : > { %2765 = vmatpush3.msra.mxu1 %v1348_v37  ;;  %2686 = vmatprep.subr.mxu0 %v1363_v38  ;;  %v1343_v47 = vld [vmem:[#allocation9 + $0x48] sm:$0xff]  ;;  %v1342_v49 = vld [vmem:[#allocation9 + $0x40] sm:$0xff]  ;;  %v1341_v51 = vld [vmem:[#allocation9 + $0x38] sm:$0xff] }
 0x24e   : > { %2766 = vmatprep.subr.mxu1 %v1347_v39  ;;  %2687 = vmatpush3.msra.mxu0 %v1363_v38  ;;  %v1356_v52 = vld [vmem:[#allocation11 + $0x30] sm:$0xff]  ;;  %v1355_v54 = vld [vmem:[#allocation11 + $0x28] sm:$0xff]  ;;  %v1354_v56 = vld [vmem:[#allocation11 + $0x20] sm:$0xff] }
 0x24f   : > { %2767 = vmatpush3.msra.mxu1 %v1347_v39  ;;  %2688 = vmatprep.subr.mxu0 %v1362_v40  ;;  %v1340_v53 = vld [vmem:[#allocation9 + $0x30] sm:$0xff]  ;;  %v1339_v55 = vld [vmem:[#allocation9 + $0x28] sm:$0xff]  ;;  %v1338_v57 = vld [vmem:[#allocation9 + $0x20] sm:$0xff] }
 0x250   : > { %2768 = vmatprep.subr.mxu1 %v1346_v41  ;;  %2689 = vmatpush3.msra.mxu0 %v1362_v40  ;;  %v1353_v58 = vld [vmem:[#allocation11 + $0x18] sm:$0xff]  ;;  %v1352_v60 = vld [vmem:[#allocation11 + $0x10] sm:$0xff]  ;;  %v1238_v63 = vld [vmem:[%s3701_s21] sm:$0xff] }
 0x251   : > { %2769 = vmatpush3.msra.mxu1 %v1346_v41  ;;  %2690 = vmatprep.subr.mxu0 %v1361_v42  ;;  %v1337_v59 = vld [vmem:[#allocation9 + $0x18] sm:$0xff]  ;;  %v1336_v61 = vld [vmem:[#allocation9 + $0x10] sm:$0xff]  ;;  %v1351_v0 = vld [vmem:[#allocation11 + $0x8] sm:$0xff] }
 0x252   : > { %2770 = vmatprep.subr.mxu1 %v1345_v43  ;;  %2691 = vmatpush3.msra.mxu0 %v1361_v42  ;;  %v1206_v62 = vld [vmem:[#allocation2 + $0xb0] sm:$0xff]  ;;  %v1335_v1 = vld [vmem:[#allocation9 + $0x8] sm:$0xff]  ;;  %v1350_v2 = vld [vmem:[#allocation11] sm:$0xff] }
 0x253   : > { %2771 = vmatpush3.msra.mxu1 %v1345_v43  ;;  %2692 = vmatprep.subr.mxu0 %v1360_v44  ;;  %v1207_v4 = vld [vmem:[#allocation2] sm:$0xff]  ;;  %v1239_v5 = vld [vmem:[%s3701_s21 + $0x8] sm:$0xff]  ;;  %v1302_v7 = vmul.f32 %v1238_v63, %v1206_v62  ;;  %v1208_v8 = vld [vmem:[#allocation2 + $0xd8] sm:$0xff]  ;;  %v1270_v10 = vadd.f32 %v1238_v63, %v1206_v62 }
 0x254   : > { %2772 = vmatprep.subr.mxu1 %v1344_v45  ;;  %2693 = vmatpush3.msra.mxu0 %v1360_v44  ;;  %v1334_v6 = vld [vmem:[#allocation9] sm:$0xff]  ;;  %v1240_v9 = vld [vmem:[%s3701_s21 + $0x10] sm:$0xff]  ;;  %v1303_v11 = vmul.f32 %v1239_v5, %v1207_v4  ;;  %v1271_v12 = vadd.f32 %v1239_v5, %v1207_v4  ;;  %v1209_v14 = vld [vmem:[#allocation2 + $0x18] sm:$0xff] }
 0x255   : > { %2773 = vmatpush3.msra.mxu1 %v1344_v45  ;;  %2694 = vmatprep.subr.mxu0 %v1359_v46  ;;  %v1304_v3 = vmul.f32 %v1240_v9, %v1208_v8  ;;  %v1272_v13 = vadd.f32 %v1240_v9, %v1208_v8  ;;  %v1241_v15 = vld [vmem:[%s3701_s21 + $0x18] sm:$0xff]  ;;  %v1210_v16 = vld [vmem:[#allocation2 + $0x50] sm:$0xff]  ;;  %v1242_v17 = vld [vmem:[%s3701_s21 + $0x20] sm:$0xff] }
 0x256   : > { %2774 = vmatprep.subr.mxu1 %v1343_v47  ;;  %2695 = vmatpush3.msra.mxu0 %v1359_v46  ;;  %v1305_v18 = vmul.f32 %v1241_v15, %v1209_v14  ;;  %v1273_v19 = vadd.f32 %v1241_v15, %v1209_v14  ;;  %v1306_v20 = vmul.f32 %v1242_v17, %v1210_v16  ;;  %v1211_v22 = vld [vmem:[#allocation2 + $0x68] sm:$0xff]  ;;  %v1212_v24 = vld [vmem:[#allocation2 + $0x30] sm:$0xff]  ;;  %v1245_v32 = vld [vmem:[%s3701_s21 + $0x38] sm:$0xff] }
 0x257   : > { %2775 = vmatpush3.msra.mxu1 %v1343_v47  ;;  %2696 = vmatprep.subr.mxu0 %v1358_v48  ;;  %v1274_v21 = vadd.f32 %v1242_v17, %v1210_v16  ;;  %v1243_v23 = vld [vmem:[%s3701_s21 + $0x28] sm:$0xff]  ;;  %v1244_v25 = vld [vmem:[%s3701_s21 + $0x30] sm:$0xff]  ;;  %v1214_v33 = vld [vmem:[#allocation2 + $0x80] sm:$0xff] }
 0x258   : > { %2776 = vmatprep.subr.mxu1 %v1342_v49  ;;  %2697 = vmatpush3.msra.mxu0 %v1358_v48  ;;  %v1307_v27 = vmul.f32 %v1243_v23, %v1211_v22  ;;  %v1275_v28 = vadd.f32 %v1243_v23, %v1211_v22  ;;  %v1308_v29 = vmul.f32 %v1244_v25, %v1212_v24  ;;  %v1213_v31 = vld [vmem:[#allocation2 + $0x48] sm:$0xff]  ;;  %v1246_v34 = vld [vmem:[%s3701_s21 + $0x40] sm:$0xff]  ;;  %v1248_v42 = vld [vmem:[%s3701_s21 + $0x50] sm:$0xff] }
 0x259   : > { %2777 = vmatpush3.msra.mxu1 %v1342_v49  ;;  %2698 = vmatprep.subr.mxu0 %v1357_v50  ;;  %v1276_v30 = vadd.f32 %v1244_v25, %v1212_v24  ;;  %v1309_v35 = vmul.f32 %v1245_v32, %v1213_v31  ;;  %v1277_v36 = vadd.f32 %v1245_v32, %v1213_v31  ;;  %v1215_v39 = vld [vmem:[#allocation2 + $0x88] sm:$0xff]  ;;  %v1217_v47 = vld [vmem:[#allocation2 + $0xb8] sm:$0xff]  ;;  %v1218_v49 = vld [vmem:[#allocation2 + $0x60] sm:$0xff] }
 0x25a   : > { %2778 = vmatprep.subr.mxu1 %v1341_v51  ;;  %2699 = vmatpush3.msra.mxu0 %v1357_v50  ;;  %v1310_v37 = vmul.f32 %v1246_v34, %v1214_v33  ;;  %v1278_v38 = vadd.f32 %v1246_v34, %v1214_v33  ;;  %v1247_v40 = vld [vmem:[%s3701_s21 + $0x48] sm:$0xff]  ;;  %v1249_v48 = vld [vmem:[%s3701_s21 + $0x58] sm:$0xff]  ;;  %v1250_v50 = vld [vmem:[%s3701_s21 + $0x60] sm:$0xff] }
 0x25b   : > { %2779 = vmatpush3.msra.mxu1 %v1341_v51  ;;  %2700 = vmatprep.subr.mxu0 %v1356_v52  ;;  %v1216_v41 = vld [vmem:[#allocation2 + $0xe8] sm:$0xff]  ;;  %v1311_v43 = vmul.f32 %v1247_v40, %v1215_v39  ;;  %v1279_v44 = vadd.f32 %v1247_v40, %v1215_v39  ;;  %v1313_v51 = vmul.f32 %v1249_v48, %v1217_v47  ;;  %v1221_v63 = vld [vmem:[#allocation2 + $0x78] sm:$0xff]  ;;  %v1226_v17 = vld [vmem:[#allocation2 + $0xe0] sm:$0xff] }
 0x25c   : > { %2780 = vmatprep.subr.mxu1 %v1340_v53  ;;  %2701 = vmatpush3.msra.mxu0 %v1356_v52  ;;  %v1312_v45 = vmul.f32 %v1248_v42, %v1216_v41  ;;  %v1280_v46 = vadd.f32 %v1248_v42, %v1216_v41  ;;  %v1281_v52 = vadd.f32 %v1249_v48, %v1217_v47  ;;  %v1255_v9 = vld [vmem:[%s3701_s21 + $0x88] sm:$0xff]  ;;  %v1227_v23 = vld [vmem:[#allocation2 + $0x90] sm:$0xff]  ;;  %v1261_v32 = vld [vmem:[%s3701_s21 + $0xb8] sm:$0xff] }
 0x25d   : > { %2781 = vmatpush3.msra.mxu1 %v1340_v53  ;;  %2702 = vmatprep.subr.mxu0 %v1355_v54  ;;  %v1314_v53 = vmul.f32 %v1250_v50, %v1218_v49  ;;  %v1225_v15 = vld [vmem:[#allocation2 + $0xc8] sm:$0xff]  ;;  %v1228_v25 = vld [vmem:[#allocation2 + $0x70] sm:$0xff]  ;;  %v1262_v34 = vld [vmem:[%s3701_s21 + $0xc0] sm:$0xff] }
 0x25e   : > { %2782 = vmatprep.subr.mxu1 %v1339_v55  ;;  %2703 = vmatpush3.msra.mxu0 %v1355_v54  ;;  %v1282_v54 = vadd.f32 %v1250_v50, %v1218_v49  ;;  %v1263_v40 = vld [vmem:[%s3701_s21 + $0xc8] sm:$0xff]  ;;  %v1264_v42 = vld [vmem:[%s3701_s21 + $0xd0] sm:$0xff]  ;;  %v1265_v48 = vld [vmem:[%s3701_s21 + $0xd8] sm:$0xff] }
 0x25f   : > { %2783 = vmatpush3.msra.mxu1 %v1339_v55  ;;  %2704 = vmatprep.subr.mxu0 %v1354_v56  ;;  %v1219_v55 = vld [vmem:[#allocation2 + $0xf0] sm:$0xff]  ;;  %v1266_v50 = vld [vmem:[%s3701_s21 + $0xe0] sm:$0xff] }
 0x260   : > { %2784 = vmatprep.subr.mxu1 %v1338_v57  ;;  %2705 = vmatpush3.msra.mxu0 %v1354_v56  ;;  %v1251_v56 = vld [vmem:[%s3701_s21 + $0x68] sm:$0xff] }
 0x261   : > { %2785 = vmatpush3.msra.mxu1 %v1338_v57  ;;  %2706 = vmatprep.subr.mxu0 %v1353_v58  ;;  %v1220_v57 = vld [vmem:[#allocation2 + $0x8] sm:$0xff] }
 0x262   : > { %2786 = vmatprep.subr.mxu1 %v1337_v59  ;;  %2707 = vmatpush3.msra.mxu0 %v1353_v58  ;;  %v1252_v58 = vld [vmem:[%s3701_s21 + $0x70] sm:$0xff] }
 0x263   : > { %2787 = vmatpush3.msra.mxu1 %v1337_v59  ;;  %2708 = vmatprep.subr.mxu0 %v1352_v60  ;;  %v1315_v59 = vmul.f32 %v1251_v56, %v1219_v55 }
 0x264   : > { %2788 = vmatprep.subr.mxu1 %v1336_v61  ;;  %2709 = vmatpush3.msra.mxu0 %v1352_v60  ;;  %v1283_v60 = vadd.f32 %v1251_v56, %v1219_v55  ;;  %v1267_v56 = vld [vmem:[%s3701_s21 + $0xe8] sm:$0xff] }
 0x265   : > { %2789 = vmatpush3.msra.mxu1 %v1336_v61  ;;  %2710 = vmatprep.subr.mxu0 %v1351_v0  ;;  %v1316_v61 = vmul.f32 %v1252_v58, %v1220_v57 }
 0x266   : > { %2790 = vmatprep.subr.mxu1 %v1335_v1  ;;  %2711 = vmatpush3.msra.mxu0 %v1351_v0  ;;  %v1253_v0 = vld [vmem:[%s3701_s21 + $0x78] sm:$0xff] }
 0x267   : > { %2791 = vmatpush3.msra.mxu1 %v1335_v1  ;;  %2712 = vmatprep.subr.mxu0 %v1350_v2  ;;  %v1222_v1 = vld [vmem:[#allocation2 + $0x38] sm:$0xff]  ;;  %v1285_v5 = vadd.f32 %v1253_v0, %v1221_v63 }
 0x268   : > { %2792 = vmatprep.subr.mxu1 %v1334_v6  ;;  %2713 = vmatpush3.msra.mxu0 %v1350_v2  ;;  %v1254_v2 = vld [vmem:[%s3701_s21 + $0x80] sm:$0xff] }
 0x269   : > { %2714 = vmatprep.mubr.f32.mxu0 %v1302_v7  ;;  %2793 = vmatpush3.msra.mxu1 %v1334_v6  ;;  %v1318_v6 = vmul.f32 %v1254_v2, %v1222_v1  ;;  %v1286_v7 = vadd.f32 %v1254_v2, %v1222_v1 }
 0x26a   : > { %2794 = vmatprep.mubr.f32.mxu1 %v1270_v10  ;;  %2715 = vmatmul.mubr.f32.vlgmr.msra.gmra.mxu0 %v1303_v11  ;;  %v1224_v10 = vld [vmem:[#allocation2 + $0x40] sm:$0xff]  ;;  %v1256_v11 = vld [vmem:[%s3701_s21 + $0x90] sm:$0xff] }
 0x26b   : > { %2795 = vmatmul.mubr.f32.vlgmr.msra.gmra.mxu1 %v1271_v12  ;;  %2717 = vmatprep.mubr.f32.mxu0 %v1304_v3 }
 0x26c   : > { %2797 = vmatprep.mubr.f32.mxu1 %v1272_v13  ;;  %3010 = vset.pattern.permute.xlu0 %v3414_v26  ;;  %v1320_v13 = vmul.f32 %v1256_v11, %v1224_v10  ;;  %v1260_v26 = vld [vmem:[%s3701_s21 + $0xb0] sm:$0xff] }
 0x26d   : > { %1868 = vperm.xlu1 %3011, %v1208_v8   ;;  %1858 = vperm.xlu0 %3010, %v1206_v62   ;;  %v1284_v62 = vadd.f32 %v1252_v58, %v1220_v57  ;;  %v1223_v8 = vld [vmem:[#allocation2 + $0x58] sm:$0xff]  ;;  %v1268_v58 = vld [vmem:[%s3701_s21 + $0xf0] sm:$0xff] }
 0x26e   : > { %2718 = vmatmul.mubr.f32.gmra.mxu0 %v1305_v18  ;;  %v1319_v12 = vmul.f32 %v1255_v9, %v1223_v8  ;;  %v1287_v3 = vadd.f32 %v1255_v9, %v1223_v8  ;;  %v1258_v18 = vld [vmem:[%s3701_s21 + $0xa0] sm:$0xff] }
 0x26f   : > { %2798 = vmatmul.mubr.f32.gmra.mxu1 %v1273_v19  ;;  %2720 = vmatprep.mubr.f32.mxu0 %v1306_v20 }
 0x270   : > { %2800 = vmatprep.mubr.f32.mxu1 %v1274_v21  ;;  %v1322_v21 = vmul.f32 %v1258_v18, %v1226_v17 }
 0x271   : > { %1873 = vperm.xlu1 %3011, %v1209_v14   ;;  %1863 = vperm.xlu0 %3010, %v1207_v4   ;;  %v1317_v4 = vmul.f32 %v1253_v0, %v1221_v63  ;;  %v1288_v14 = vadd.f32 %v1256_v11, %v1224_v10  ;;  %v1269_v0 = vld [vmem:[%s3701_s21 + $0xf8] sm:$0xff] }
 0x272   : > { %2721 = vmatmul.mubr.f32.gmra.mxu0 %v1307_v27 }
 0x273   : > { %2801 = vmatmul.mubr.f32.gmra.mxu1 %v1275_v28  ;;  %2723 = vmatprep.mubr.f32.mxu0 %v1308_v29  ;;  %v1324_v29 = vmul.f32 %v1260_v26, %v1228_v25 }
 0x274   : > { %2803 = vmatprep.mubr.f32.mxu1 %v1276_v30  ;;  %v1292_v30 = vadd.f32 %v1260_v26, %v1228_v25 }
 0x275   : > { %1883 = vperm.xlu1 %3011, %v1211_v22   ;;  %1878 = vperm.xlu0 %3010, %v1210_v16   ;;  %v1257_v16 = vld [vmem:[%s3701_s21 + $0x98] sm:$0xff]  ;;  %v1290_v22 = vadd.f32 %v1258_v18, %v1226_v17 }
 0x276   : > { %2724 = vmatmul.mubr.f32.gmra.mxu0 %v1309_v35  ;;  %v1321_v19 = vmul.f32 %v1257_v16, %v1225_v15  ;;  %v1289_v20 = vadd.f32 %v1257_v16, %v1225_v15 }
 0x277   : > { %2804 = vmatmul.mubr.f32.gmra.mxu1 %v1277_v36  ;;  %2726 = vmatprep.mubr.f32.mxu0 %v1310_v37 }
 0x278   : > { %2806 = vmatprep.mubr.f32.mxu1 %v1278_v38 }
 0x279   : > { %1893 = vperm.xlu1 %3011, %v1213_v31   ;;  %1888 = vperm.xlu0 %3010, %v1212_v24   ;;  %v1259_v24 = vld [vmem:[%s3701_s21 + $0xa8] sm:$0xff]  ;;  %v1229_v31 = vld [vmem:[#allocation2 + $0xc0] sm:$0xff] }
 0x27a   : > { %2727 = vmatmul.mubr.f32.gmra.mxu0 %v1311_v43  ;;  %v1323_v27 = vmul.f32 %v1259_v24, %v1227_v23  ;;  %v1291_v28 = vadd.f32 %v1259_v24, %v1227_v23  ;;  %v1325_v35 = vmul.f32 %v1261_v32, %v1229_v31  ;;  %v1293_v36 = vadd.f32 %v1261_v32, %v1229_v31 }
 0x27b   : > { %2807 = vmatmul.mubr.f32.gmra.mxu1 %v1279_v44  ;;  %2729 = vmatprep.mubr.f32.mxu0 %v1312_v45 }
 0x27c   : > { %2809 = vmatprep.mubr.f32.mxu1 %v1280_v46 }
 0x27d   : > { %1903 = vperm.xlu1 %3011, %v1215_v39   ;;  %1898 = vperm.xlu0 %3010, %v1214_v33   ;;  %v1230_v33 = vld [vmem:[#allocation2 + $0xa8] sm:$0xff]  ;;  %v1231_v39 = vld [vmem:[#allocation2 + $0xd0] sm:$0xff] }
 0x27e   : > { %2730 = vmatmul.mubr.f32.gmra.mxu0 %v1313_v51  ;;  %v1326_v37 = vmul.f32 %v1262_v34, %v1230_v33  ;;  %v1294_v38 = vadd.f32 %v1262_v34, %v1230_v33  ;;  %v1327_v43 = vmul.f32 %v1263_v40, %v1231_v39  ;;  %v1295_v44 = vadd.f32 %v1263_v40, %v1231_v39 }
 0x27f   : > { %2810 = vmatmul.mubr.f32.gmra.mxu1 %v1281_v52  ;;  %2732 = vmatprep.mubr.f32.mxu0 %v1314_v53 }
 0x280   : > { %2812 = vmatprep.mubr.f32.mxu1 %v1282_v54 }
 0x281   : > { %1913 = vperm.xlu1 %3011, %v1217_v47   ;;  %1908 = vperm.xlu0 %3010, %v1216_v41   ;;  %v1232_v41 = vld [vmem:[#allocation2 + $0x10] sm:$0xff]  ;;  %v1233_v47 = vld [vmem:[#allocation2 + $0x28] sm:$0xff] }
 0x282   : > { %2733 = vmatmul.mubr.f32.gmra.mxu0 %v1315_v59  ;;  %v1328_v45 = vmul.f32 %v1264_v42, %v1232_v41  ;;  %v1296_v46 = vadd.f32 %v1264_v42, %v1232_v41  ;;  %v1329_v51 = vmul.f32 %v1265_v48, %v1233_v47  ;;  %v1297_v52 = vadd.f32 %v1265_v48, %v1233_v47 }
 0x283   : > { %2813 = vmatmul.mubr.f32.gmra.mxu1 %v1283_v60  ;;  %2735 = vmatprep.mubr.f32.mxu0 %v1316_v61 }
 0x284   : > { %2815 = vmatprep.mubr.f32.mxu1 %v1284_v62 }
 0x285   : > { %1923 = vperm.xlu1 %3011, %v1219_v55   ;;  %1918 = vperm.xlu0 %3010, %v1218_v49   ;;  %v1234_v49 = vld [vmem:[#allocation2 + $0xa0] sm:$0xff]  ;;  %v1235_v55 = vld [vmem:[#allocation2 + $0xf8] sm:$0xff] }
 0x286   : > { %2736 = vmatmul.mubr.f32.gmra.mxu0 %v1317_v4  ;;  %v1330_v53 = vmul.f32 %v1266_v50, %v1234_v49  ;;  %v1298_v54 = vadd.f32 %v1266_v50, %v1234_v49  ;;  %v1331_v59 = vmul.f32 %v1267_v56, %v1235_v55  ;;  %v1299_v60 = vadd.f32 %v1267_v56, %v1235_v55 }
 0x287   : > { %2816 = vmatmul.mubr.f32.gmra.mxu1 %v1285_v5  ;;  %2738 = vmatprep.mubr.f32.mxu0 %v1318_v6 }
 0x288   : > { %2818 = vmatprep.mubr.f32.mxu1 %v1286_v7 }
 0x289   : > { %1933 = vperm.xlu1 %3011, %v1221_v63   ;;  %1928 = vperm.xlu0 %3010, %v1220_v57   ;;  %v1236_v57 = vld [vmem:[#allocation2 + $0x20] sm:$0xff]  ;;  %v1237_v63 = vld [vmem:[#allocation2 + $0x98] sm:$0xff] }
 0x28a   : > { %2739 = vmatmul.mubr.f32.gmra.mxu0 %v1319_v12  ;;  %v1332_v61 = vmul.f32 %v1268_v58, %v1236_v57  ;;  %v1300_v62 = vadd.f32 %v1268_v58, %v1236_v57  ;;  %v1301_v2 = vadd.f32 %v1269_v0, %v1237_v63 }
 0x28b   : > { %2819 = vmatmul.mubr.f32.gmra.mxu1 %v1287_v3  ;;  %2741 = vmatprep.mubr.f32.mxu0 %v1320_v13  ;;  %v4028_v13 = vld [vmem:[#allocation14] ss:$0 sm:$0xff] }
 0x28c   : > { %2821 = vmatprep.mubr.f32.mxu1 %v1288_v14 }
 0x28d   : > { %1943 = vperm.xlu1 %3011, %v1223_v8   ;;  %1938 = vperm.xlu0 %3010, %v1222_v1   ;;  %v1333_v1 = vmul.f32 %v1269_v0, %v1237_v63 }
 0x28e   : > { %2742 = vmatmul.mubr.f32.gmra.mxu0 %v1321_v19 }
 0x28f   : > { %2822 = vmatmul.mubr.f32.gmra.mxu1 %v1289_v20  ;;  %2744 = vmatprep.mubr.f32.mxu0 %v1322_v21 }
 0x290   : > { %2824 = vmatprep.mubr.f32.mxu1 %v1290_v22 }
 0x291   : > { %1953 = vperm.xlu1 %3011, %v1225_v15   ;;  %1948 = vperm.xlu0 %3010, %v1224_v10  }
 0x292   : > { %2745 = vmatmul.mubr.f32.gmra.mxu0 %v1323_v27 }
 0x293   : > { %2825 = vmatmul.mubr.f32.gmra.mxu1 %v1291_v28  ;;  %2747 = vmatprep.mubr.f32.mxu0 %v1324_v29 }
 0x294   : > { %2827 = vmatprep.mubr.f32.mxu1 %v1292_v30 }
 0x295   : > { %1963 = vperm.xlu1 %3011, %v1227_v23   ;;  %1958 = vperm.xlu0 %3010, %v1226_v17   ;;  %v4032_v17 = vld [vmem:[#allocation12] ss:$0 sm:$0xff] }
 0x296   : > { %2748 = vmatmul.mubr.f32.gmra.mxu0 %v1325_v35 }
 0x297   : > { %2828 = vmatmul.mubr.f32.gmra.mxu1 %v1293_v36  ;;  %2750 = vmatprep.mubr.f32.mxu0 %v1326_v37 }
 0x298   : > { %2830 = vmatprep.mubr.f32.mxu1 %v1294_v38 }
 0x299   : > { %1973 = vperm.xlu1 %3011, %v1229_v31   ;;  %1968 = vperm.xlu0 %3010, %v1228_v25  }
 0x29a   : > { %2751 = vmatmul.mubr.f32.gmra.mxu0 %v1327_v43 }
 0x29b   : > { %2831 = vmatmul.mubr.f32.gmra.mxu1 %v1295_v44  ;;  %2753 = vmatprep.mubr.f32.mxu0 %v1328_v45 }
 0x29c   : > { %2833 = vmatprep.mubr.f32.mxu1 %v1296_v46 }
 0x29d   : > { %1983 = vperm.xlu1 %3011, %v1231_v39   ;;  %1978 = vperm.xlu0 %3010, %v1230_v33  }
 0x29e   : > { %2754 = vmatmul.mubr.f32.gmra.mxu0 %v1329_v51 }
 0x29f   : > { %2834 = vmatmul.mubr.f32.gmra.mxu1 %v1297_v52  ;;  %2756 = vmatprep.mubr.f32.mxu0 %v1330_v53 }
 0x2a0   : > { %2836 = vmatprep.mubr.f32.mxu1 %v1298_v54 }
 0x2a1   : > { %1993 = vperm.xlu1 %3011, %v1233_v47   ;;  %1988 = vperm.xlu0 %3010, %v1232_v41  }
 0x2a2   : > { %2757 = vmatmul.mubr.f32.gmra.mxu0 %v1331_v59 }
 0x2a3   : > { %2837 = vmatmul.mubr.f32.gmra.mxu1 %v1299_v60  ;;  %2759 = vmatprep.mubr.f32.mxu0 %v1332_v61 }
 0x2a4   : > { %2839 = vmatprep.mubr.f32.mxu1 %v1300_v62 }
 0x2a5   : > { %2003 = vperm.xlu1 %3011, %v1235_v55   ;;  %1998 = vperm.xlu0 %3010, %v1234_v49  }
 0x2a6   : > { %2760 = vmatmul.mubr.f32.gmra.mxu0 %v1333_v1 }
 0x2a7   : > { %2840 = vmatmul.mubr.f32.gmra.mxu1 %v1301_v2 }
 0x2a9   : > { %2013 = vperm.xlu1 %3011, %v1237_v63   ;;  %2008 = vperm.xlu0 %3010, %v1236_v57  }
 0x2e8   : > { %v1869_v4 = vpop.permute.xlu1 %1868  ;;  %v1859_v5 = vpop.permute.xlu0 %1858 }
 0x2e9   : > { %v2022_v23 = vmul.f32 %v4028_v13, %v1859_v5  ;;  %v2024_v40 = vmul.f32 %v4028_v13, %v1869_v4 }
 0x2ec   : > { %v1874_v6 = vpop.permute.xlu1 %1873  ;;  %v1864_v7 = vpop.permute.xlu0 %1863 }
 0x2ed   : > { %v2023_v18 = vmul.f32 %v4028_v13, %v1864_v7  ;;  %v2025_v32 = vmul.f32 %v4028_v13, %v1874_v6 }
 0x2f0   : > { %v1884_v8 = vpop.permute.xlu1 %1883  ;;  %v1879_v9 = vpop.permute.xlu0 %1878 }
 0x2f1   : > { %v2027_v55 = vmul.f32 %v4028_v13, %v1884_v8  ;;  %v2026_v60 = vmul.f32 %v4028_v13, %v1879_v9 }
 0x2f4   : > { %v1894_v10 = vpop.permute.xlu1 %1893  ;;  %v4022_v11 = vpop.permute.xlu0 %1888 }
 0x2f5   : > { %v2029_v7 = vmul.f32 %v4028_v13, %v1894_v10 }
 0x2f8   : > { %v4024_v12 = vpop.permute.xlu1 %1903  ;;  %v4026_v3 = vpop.permute.xlu0 %1898 }
 0x2fc   : > { %v4030_v14 = vpop.permute.xlu1 %1913  ;;  %v4035_v19 = vpop.permute.xlu0 %1908 }
 0x300   : > { %v4039_v28 = vpop.permute.xlu1 %1923  ;;  %v4043_v35 = vpop.permute.xlu0 %1918 }
 0x304   : > { %v4050_v50 = vpop.permute.xlu1 %1933  ;;  %v4059_v61 = vpop.permute.xlu0 %1928 }
 0x32a   : > { %v2716_v15 = vpop.f32.mrf.mxu0 }
 0x32b   : > { %v2796_v16 = vpop.f32.mrf.mxu1 }
 0x32c   : > { %v1663_v20 = vadd.f32 %v2796_v16, %v2716_v15  ;;  %v1432_v21 = vpop.f32.mrf.mxu0  ;;  %v2028_v16 = vmul.f32 %v4028_v13, %v4022_v11 }
 0x32d   : > { %v1657_v22 = vpop.f32.mrf.mxu1 }
 0x32e   : > { %v1824_v24 = vadd.f32 %v4032_v17, %v1663_v20  ;;  %v1658_v25 = vadd.f32 %v1657_v22, %v1432_v21  ;;  %v2719_v26 = vpop.f32.mrf.mxu0  ;;  %v4070_v21 = vpop.permute.xlu1 %1943 }
 0x32f   : > { %v2799_v27 = vpop.f32.mrf.mxu1 }
 0x330   : > { %v2055_v29 = vadd.f32 %v2023_v18, %v1824_v24  ;;  %v1823_v30 = vadd.f32 %v4032_v17, %v1658_v25  ;;  %v1673_v31 = vadd.f32 %v2799_v27, %v2719_v26  ;;  %v1442_v33 = vpop.f32.mrf.mxu0 }
 0x331   : > { %v1667_v34 = vpop.f32.mrf.mxu1 }
 0x332   : > { %v2054_v36 = vadd.f32 %v2022_v23, %v1823_v30  ;;  %v1826_v37 = vadd.f32 %v4032_v17, %v1673_v31  ;;  %v1668_v38 = vadd.f32 %v1667_v34, %v1442_v33  ;;  %v2087_v39 = vmul.f32 0.2, %v2055_v29  ;;  %v2722_v41 = vpop.f32.mrf.mxu0  ;;  %v4077_v31 = vpop.permute.xlu0 %1938 }
 0x333   : > { %v2802_v42 = vpop.f32.mrf.mxu1 }
 0x334   : > { %v2057_v43 = vadd.f32 %v2025_v32, %v1826_v37  ;;  %v1825_v44 = vadd.f32 %v4032_v17, %v1668_v38  ;;  %v1683_v45 = vadd.f32 %v2802_v42, %v2722_v41  ;;  %v4048_v46 = vmax.f32 %v2055_v29, %v2087_v39  ;;  %v1452_v47 = vpop.f32.mrf.mxu0 }
 0x335   : > { %v1677_v48 = vpop.f32.mrf.mxu1  ;;  %v2086_v49 = vmul.f32 0.2, %v2054_v36  ;;  %v2030_v37 = vmul.f32 %v4028_v13, %v4026_v3  ;;  %v4093_v3 = vpop.permute.xlu1 %1953 }
 0x336   : > { %v2056_v51 = vadd.f32 %v2024_v40, %v1825_v44  ;;  %v1828_v52 = vadd.f32 %v4032_v17, %v1683_v45  ;;  %v1678_v53 = vadd.f32 %v1677_v48, %v1452_v47  ;;  %v2151_v54 = vmul.f32 %v4048_v46, %v4048_v46  ;;  %v2725_v56 = vpop.f32.mrf.mxu0 }
 0x337   : > { %v2805_v57 = vpop.f32.mrf.mxu1  ;;  %v4056_v58 = vmax.f32 %v2054_v36, %v2086_v49  ;;  %v2089_v59 = vmul.f32 0.2, %v2057_v43  ;;  %v2031_v36 = vmul.f32 %v4028_v13, %v4024_v12 }
 0x338   : > { %v1827_v62 = vadd.f32 %v4032_v17, %v1678_v53  ;;  %v1693_v63 = vadd.f32 %v2805_v57, %v2725_v56  ;;  %2184 = vadd.xlane.f32.xlu1 %v2151_v54  ;;  %v2059_v0 = vadd.f32 %v2027_v55, %v1828_v52  ;;  %v1462_v1 = vpop.f32.mrf.mxu0  ;;  %v2088_v6 = vmul.f32 0.2, %v2056_v51 }
 0x339   : > { %v1687_v2 = vpop.f32.mrf.mxu1  ;;  %v2150_v4 = vmul.f32 %v4056_v58, %v4056_v58  ;;  %v4064_v5 = vmax.f32 %v2057_v43, %v2089_v59  ;;  %v2033_v54 = vmul.f32 %v4028_v13, %v4030_v14  ;;  %v2032_v55 = vmul.f32 %v4028_v13, %v4035_v19 }
 0x33a   : > { %v2058_v8 = vadd.f32 %v2026_v60, %v1827_v62  ;;  %v1830_v9 = vadd.f32 %v4032_v17, %v1693_v63  ;;  %v1688_v15 = vadd.f32 %v1687_v2, %v1462_v1  ;;  %v2728_v18 = vpop.f32.mrf.mxu0  ;;  %v4075_v29 = vmax.f32 %v2056_v51, %v2088_v6  ;;  %v4102_v60 = vpop.permute.xlu0 %1948 }
 0x33b   : > { %2182 = vadd.xlane.f32.xlu0 %v2150_v4  ;;  %v2808_v20 = vpop.f32.mrf.mxu1  ;;  %v2153_v10 = vmul.f32 %v4064_v5, %v4064_v5  ;;  %v2091_v30 = vmul.f32 0.2, %v2059_v0 }
 0x33c   : > { %v2061_v22 = vadd.f32 %v2029_v7, %v1830_v9  ;;  %v1829_v23 = vadd.f32 %v4032_v17, %v1688_v15  ;;  %v1703_v24 = vadd.f32 %v2808_v20, %v2728_v18  ;;  %v2090_v25 = vmul.f32 0.2, %v2058_v8  ;;  %v1472_v26 = vpop.f32.mrf.mxu0 }
 0x33d   : > { %v1697_v27 = vpop.f32.mrf.mxu1  ;;  %v2152_v48 = vmul.f32 %v4075_v29, %v4075_v29  ;;  %v4091_v49 = vmax.f32 %v2059_v0, %v2091_v30  ;;  %v2035_v18 = vmul.f32 %v4028_v13, %v4039_v28  ;;  %v2034_v20 = vmul.f32 %v4028_v13, %v4043_v35 }
 0x33e   : > { %v2060_v11 = vadd.f32 %v2028_v16, %v1829_v23  ;;  %v1832_v32 = vadd.f32 %v4032_v17, %v1703_v24  ;;  %v1698_v33 = vadd.f32 %v1697_v27, %v1472_v26  ;;  %v4080_v34 = vmax.f32 %v2058_v8, %v2090_v25  ;;  %v2731_v38 = vpop.f32.mrf.mxu0  ;;  %v4118_v24 = vpop.permute.xlu1 %1963 }
 0x33f   : > { %2188 = vadd.xlane.f32.xlu0 %v2153_v10  ;;  %v2811_v39 = vpop.f32.mrf.mxu1  ;;  %v2093_v43 = vmul.f32 0.2, %v2061_v22  ;;  %v2155_v19 = vmul.f32 %v4091_v49, %v4091_v49 }
 0x340   : > { %v1831_v40 = vadd.f32 %v4032_v17, %v1698_v33  ;;  %v1713_v41 = vadd.f32 %v2811_v39, %v2731_v38  ;;  %v2154_v42 = vmul.f32 %v4080_v34, %v4080_v34  ;;  %v2063_v44 = vadd.f32 %v2031_v36, %v1832_v32  ;;  %v1482_v45 = vpop.f32.mrf.mxu0 }
 0x341   : > { %v1707_v47 = vpop.f32.mrf.mxu1  ;;  %v2092_v12 = vmul.f32 0.2, %v2060_v11  ;;  %v4105_v1 = vmax.f32 %v2061_v22, %v2093_v43  ;;  %v2037_v36 = vmul.f32 %v4028_v13, %v4050_v50 }
 0x342   : > { %v2062_v51 = vadd.f32 %v2030_v37, %v1831_v40  ;;  %v1834_v52 = vadd.f32 %v4032_v17, %v1713_v41  ;;  %v1708_v53 = vadd.f32 %v1707_v47, %v1482_v45  ;;  %2190 = vadd.xlane.f32.xlu1 %v2154_v42  ;;  %v2734_v56 = vpop.f32.mrf.mxu0  ;;  %v2095_v7 = vmul.f32 0.2, %v2063_v44  ;;  %v4129_v37 = vpop.permute.xlu0 %1958 }
 0x343   : > { %2186 = vadd.xlane.f32.xlu0 %v2152_v48  ;;  %v2814_v57 = vpop.f32.mrf.mxu1  ;;  %v4100_v59 = vmax.f32 %v2060_v11, %v2092_v12  ;;  %v2157_v10 = vmul.f32 %v4105_v1, %v4105_v1  ;;  %v2036_v41 = vmul.f32 %v4028_v13, %v4059_v61 }
 0x344   : > { %v1833_v62 = vadd.f32 %v4032_v17, %v1708_v53  ;;  %v1723_v63 = vadd.f32 %v2814_v57, %v2734_v56  ;;  %v2094_v0 = vmul.f32 0.2, %v2062_v51  ;;  %v2065_v2 = vadd.f32 %v2033_v54, %v1834_v52  ;;  %v1492_v4 = vpop.f32.mrf.mxu0 }
 0x345   : > { %v1717_v6 = vpop.f32.mrf.mxu1  ;;  %v2156_v14 = vmul.f32 %v4100_v59, %v4100_v59  ;;  %v4125_v35 = vmax.f32 %v2063_v44, %v2095_v7 }
 0x346   : > { %v2064_v8 = vadd.f32 %v2032_v55, %v1833_v62  ;;  %v1836_v9 = vadd.f32 %v4032_v17, %v1723_v63  ;;  %v1718_v15 = vadd.f32 %v1717_v6, %v1492_v4  ;;  %v4112_v16 = vmax.f32 %v2062_v51, %v2094_v0  ;;  %v2737_v22 = vpop.f32.mrf.mxu0  ;;  %v4143_v55 = vpop.permute.xlu1 %1973 }
 0x347   : > { %2194 = vadd.xlane.f32.xlu1 %v2156_v14  ;;  %2192 = vadd.xlane.f32.xlu0 %v2155_v19  ;;  %v2817_v23 = vpop.f32.mrf.mxu1  ;;  %v2097_v33 = vmul.f32 0.2, %v2065_v2  ;;  %v2159_v53 = vmul.f32 %v4125_v35, %v4125_v35  ;;  %v2039_v0 = vmul.f32 %v4028_v13, %v4070_v21  ;;  %v2038_v4 = vmul.f32 %v4028_v13, %v4077_v31  ;;  %v1969_v14 = vpop.permute.xlu0 %1968 }
 0x348   : > { %v1835_v25 = vadd.f32 %v4032_v17, %v1718_v15  ;;  %v1733_v26 = vadd.f32 %v2817_v23, %v2737_v22  ;;  %v2158_v27 = vmul.f32 %v4112_v16, %v4112_v16  ;;  %v2067_v30 = vadd.f32 %v2035_v18, %v1836_v9  ;;  %v1502_v28 = vpop.f32.mrf.mxu0 }
 0x349   : > { %v1727_v11 = vpop.f32.mrf.mxu1  ;;  %v2096_v32 = vmul.f32 0.2, %v2064_v8  ;;  %v4141_v61 = vmax.f32 %v2065_v2, %v2097_v33 }
 0x34a   : > { %v2066_v38 = vadd.f32 %v2034_v20, %v1835_v25  ;;  %v1838_v39 = vadd.f32 %v4032_v17, %v1733_v26  ;;  %v1728_v40 = vadd.f32 %v1727_v11, %v1502_v28  ;;  %v2740_v42 = vpop.f32.mrf.mxu0  ;;  %v2099_v54 = vmul.f32 0.2, %v2067_v30  ;;  %v1984_v33 = vpop.permute.xlu1 %1983 }
 0x34b   : > { %2198 = vadd.xlane.f32.xlu1 %v2158_v27  ;;  %2196 = vadd.xlane.f32.xlu0 %v2157_v10  ;;  %v2820_v43 = vpop.f32.mrf.mxu1  ;;  %v4134_v45 = vmax.f32 %v2064_v8, %v2096_v32  ;;  %v2161_v21 = vmul.f32 %v4141_v61, %v4141_v61  ;;  %v2041_v27 = vmul.f32 %v4028_v13, %v4093_v3 }
 0x34c   : > { %v2069_v44 = vadd.f32 %v2037_v36, %v1838_v39  ;;  %v1837_v47 = vadd.f32 %v4032_v17, %v1728_v40  ;;  %v1743_v48 = vadd.f32 %v2820_v43, %v2740_v42  ;;  %v2098_v50 = vmul.f32 0.2, %v2066_v38  ;;  %v1512_v12 = vpop.f32.mrf.mxu0 }
 0x34d   : > { %v1737_v51 = vpop.f32.mrf.mxu1  ;;  %v2160_v52 = vmul.f32 %v4134_v45, %v4134_v45  ;;  %v4157_v31 = vmax.f32 %v2067_v30, %v2099_v54  ;;  %v2040_v10 = vmul.f32 %v4028_v13, %v4102_v60 }
 0x34e   : > { %v2068_v56 = vadd.f32 %v2036_v41, %v1837_v47  ;;  %v1840_v57 = vadd.f32 %v4032_v17, %v1743_v48  ;;  %v1738_v62 = vadd.f32 %v1737_v51, %v1512_v12  ;;  %v4146_v63 = vmax.f32 %v2066_v38, %v2098_v50  ;;  %v2743_v6 = vpop.f32.mrf.mxu0  ;;  %v1979_v47 = vpop.permute.xlu0 %1978 }
 0x34f   : > { %2202 = vadd.xlane.f32.xlu1 %v2160_v52  ;;  %2200 = vadd.xlane.f32.xlu0 %v2159_v53  ;;  %v2823_v2 = vpop.f32.mrf.mxu1  ;;  %v2101_v9 = vmul.f32 0.2, %v2069_v44  ;;  %v2163_v60 = vmul.f32 %v4157_v31, %v4157_v31  ;;  %v2042_v52 = vmul.f32 %v4028_v13, %v4129_v37 }
 0x350   : > { %v1839_v19 = vadd.f32 %v4032_v17, %v1738_v62  ;;  %v1753_v7 = vadd.f32 %v2823_v2, %v2743_v6  ;;  %v2162_v8 = vmul.f32 %v4146_v63, %v4146_v63  ;;  %v2071_v15 = vadd.f32 %v2039_v0, %v1840_v57  ;;  %v1522_v18 = vpop.f32.mrf.mxu0 }
 0x351   : > { %v1747_v20 = vpop.f32.mrf.mxu1  ;;  %v2100_v22 = vmul.f32 0.2, %v2068_v56  ;;  %v4167_v39 = vmax.f32 %v2069_v44, %v2101_v9  ;;  %v2043_v44 = vmul.f32 %v4028_v13, %v4118_v24 }
 0x352   : > { %v2070_v23 = vadd.f32 %v2038_v4, %v1839_v19  ;;  %v1842_v25 = vadd.f32 %v4032_v17, %v1753_v7  ;;  %v1748_v26 = vadd.f32 %v1747_v20, %v1522_v18  ;;  %v2746_v28 = vpop.f32.mrf.mxu0  ;;  %v2103_v43 = vmul.f32 0.2, %v2071_v15 }
 0x353   : > { %2206 = vadd.xlane.f32.xlu1 %v2162_v8  ;;  %2204 = vadd.xlane.f32.xlu0 %v2161_v21  ;;  %v2826_v11 = vpop.f32.mrf.mxu1  ;;  %v4164_v32 = vmax.f32 %v2068_v56, %v2100_v22  ;;  %v2165_v0 = vmul.f32 %v4167_v39, %v4167_v39  ;;  %v2045_v7 = vmul.f32 %v4028_v13, %v4143_v55  ;;  %v1994_v8 = vpop.permute.xlu1 %1993 }
 0x354   : > { %v1841_v30 = vadd.f32 %v4032_v17, %v1748_v26  ;;  %v1763_v36 = vadd.f32 %v2826_v11, %v2746_v28  ;;  %v2102_v38 = vmul.f32 0.2, %v2070_v23  ;;  %v2073_v40 = vadd.f32 %v2041_v27, %v1842_v25  ;;  %v1532_v41 = vpop.f32.mrf.mxu0  ;;  %v1989_v26 = vpop.permute.xlu0 %1988 }
 0x355   : > { %v1757_v42 = vpop.f32.mrf.mxu1  ;;  %v2164_v3 = vmul.f32 %v4164_v32, %v4164_v32  ;;  %v4185_v19 = vmax.f32 %v2071_v15, %v2103_v43  ;;  %v2044_v21 = vmul.f32 %v4028_v13, %v1969_v14  ;;  %v2047_v43 = vmul.f32 %v4028_v13, %v1984_v33 }
 0x356   : > { %v2072_v48 = vadd.f32 %v2040_v10, %v1841_v30  ;;  %v1844_v50 = vadd.f32 %v4032_v17, %v1763_v36  ;;  %v1758_v12 = vadd.f32 %v1757_v42, %v1532_v41  ;;  %v4174_v51 = vmax.f32 %v2070_v23, %v2102_v38  ;;  %v2749_v53 = vpop.f32.mrf.mxu0 }
 0x357   : > { %2210 = vadd.xlane.f32.xlu1 %v2164_v3  ;;  %2208 = vadd.xlane.f32.xlu0 %v2163_v60  ;;  %v2829_v54 = vpop.f32.mrf.mxu1  ;;  %v2105_v37 = vmul.f32 0.2, %v2073_v40  ;;  %v2167_v14 = vmul.f32 %v4185_v19, %v4185_v19 }
 0x358   : > { %v1843_v56 = vadd.f32 %v4032_v17, %v1758_v12  ;;  %v1773_v57 = vadd.f32 %v2829_v54, %v2749_v53  ;;  %v2166_v62 = vmul.f32 %v4174_v51, %v4174_v51  ;;  %v2075_v4 = vadd.f32 %v2043_v44, %v1844_v50  ;;  %v1542_v6 = vpop.f32.mrf.mxu0  ;;  %v2004_v44 = vpop.permute.xlu1 %2003 }
 0x359   : > { %v1767_v2 = vpop.f32.mrf.mxu1  ;;  %v2104_v24 = vmul.f32 0.2, %v2072_v48  ;;  %v4198_v36 = vmax.f32 %v2073_v40, %v2105_v37 }
 0x35a   : > { %v2074_v9 = vadd.f32 %v2042_v52, %v1843_v56  ;;  %v1846_v18 = vadd.f32 %v4032_v17, %v1773_v57  ;;  %v1768_v20 = vadd.f32 %v1767_v2, %v1542_v6  ;;  %v2752_v22 = vpop.f32.mrf.mxu0  ;;  %v2107_v38 = vmul.f32 0.2, %v2075_v4  ;;  %v1999_v6 = vpop.permute.xlu0 %1998 }
 0x35b   : > { %2214 = vadd.xlane.f32.xlu1 %v2166_v62  ;;  %2212 = vadd.xlane.f32.xlu0 %v2165_v0  ;;  %v2832_v23 = vpop.f32.mrf.mxu1  ;;  %v4191_v25 = vmax.f32 %v2072_v48, %v2104_v24  ;;  %v2046_v48 = vmul.f32 %v4028_v13, %v1979_v47  ;;  %v2169_v33 = vmul.f32 %v4198_v36, %v4198_v36 }
 0x35c   : > { %v2077_v15 = vadd.f32 %v2045_v7, %v1846_v18  ;;  %v1845_v27 = vadd.f32 %v4032_v17, %v1768_v20  ;;  %v1783_v10 = vadd.f32 %v2832_v23, %v2752_v22  ;;  %v2106_v28 = vmul.f32 0.2, %v2074_v9  ;;  %v1552_v55 = vpop.f32.mrf.mxu0 }
 0x35d   : > { %v1777_v11 = vpop.f32.mrf.mxu1  ;;  %v2168_v30 = vmul.f32 %v4191_v25, %v4191_v25  ;;  %v4210_v47 = vmax.f32 %v2075_v4, %v2107_v38  ;;  %v2049_v7 = vmul.f32 %v4028_v13, %v1994_v8 }
 0x35e   : > { %v2076_v41 = vadd.f32 %v2044_v21, %v1845_v27  ;;  %v1848_v42 = vadd.f32 %v4032_v17, %v1783_v10  ;;  %v1778_v3 = vadd.f32 %v1777_v11, %v1552_v55  ;;  %v4201_v60 = vmax.f32 %v2074_v9, %v2106_v28  ;;  %v2755_v50 = vpop.f32.mrf.mxu0 }
 0x35f   : > { %2218 = vadd.xlane.f32.xlu1 %v2168_v30  ;;  %2216 = vadd.xlane.f32.xlu0 %v2167_v14  ;;  %v2835_v12 = vpop.f32.mrf.mxu1  ;;  %v2109_v54 = vmul.f32 0.2, %v2077_v15  ;;  %v2048_v9 = vmul.f32 %v4028_v13, %v1989_v26  ;;  %v2171_v26 = vmul.f32 %v4210_v47, %v4210_v47  ;;  %v2014_v30 = vpop.permute.xlu1 %2013 }
 0x360   : > { %v1847_v52 = vadd.f32 %v4032_v17, %v1778_v3  ;;  %v1793_v40 = vadd.f32 %v2835_v12, %v2755_v50  ;;  %v2170_v53 = vmul.f32 %v4201_v60, %v4201_v60  ;;  %v2079_v56 = vadd.f32 %v2047_v43, %v1848_v42  ;;  %v1562_v57 = vpop.f32.mrf.mxu0  ;;  %v2009_v50 = vpop.permute.xlu0 %2008 }
 0x361   : > { %v1787_v62 = vpop.f32.mrf.mxu1  ;;  %v2108_v0 = vmul.f32 0.2, %v2076_v41  ;;  %v4218_v27 = vmax.f32 %v2077_v15, %v2109_v54  ;;  %v2051_v15 = vmul.f32 %v4028_v13, %v2004_v44  ;;  %v2050_v3 = vmul.f32 %v4028_v13, %v1999_v6 }
 0x362   : > { %v2078_v2 = vadd.f32 %v2046_v48, %v1847_v52  ;;  %v1850_v24 = vadd.f32 %v4032_v17, %v1793_v40  ;;  %v1788_v37 = vadd.f32 %v1787_v62, %v1562_v57  ;;  %v2758_v18 = vpop.f32.mrf.mxu0  ;;  %v2111_v11 = vmul.f32 0.2, %v2079_v56 }
 0x363   : > { %2222 = vadd.xlane.f32.xlu1 %v2170_v53  ;;  %2220 = vadd.xlane.f32.xlu0 %v2169_v33  ;;  %v2838_v20 = vpop.f32.mrf.mxu1  ;;  %v4215_v21 = vmax.f32 %v2076_v41, %v2108_v0  ;;  %v2173_v53 = vmul.f32 %v4218_v27, %v4218_v27  ;;  %v2053_v6 = vmul.f32 %v4028_v13, %v2014_v30 }
 0x364   : > { %v1849_v22 = vadd.f32 %v4032_v17, %v1788_v37  ;;  %v1803_v23 = vadd.f32 %v2838_v20, %v2758_v18  ;;  %v2110_v4 = vmul.f32 0.2, %v2078_v2  ;;  %v2081_v10 = vadd.f32 %v2049_v7, %v1850_v24  ;;  %v1572_v28 = vpop.f32.mrf.mxu0 }
 0x365   : > { %v1797_v55 = vpop.f32.mrf.mxu1  ;;  %v2172_v8 = vmul.f32 %v4215_v21, %v4215_v21  ;;  %v4234_v33 = vmax.f32 %v2079_v56, %v2111_v11 }
 0x366   : > { %v2080_v14 = vadd.f32 %v2048_v9, %v1849_v22  ;;  %v1852_v38 = vadd.f32 %v4032_v17, %v1803_v23  ;;  %v1798_v41 = vadd.f32 %v1797_v55, %v1572_v28  ;;  %v4225_v42 = vmax.f32 %v2078_v2, %v2110_v4  ;;  %v2761_v43 = vpop.f32.mrf.mxu0 }
 0x367   : > { %2226 = vadd.xlane.f32.xlu1 %v2172_v8  ;;  %2224 = vadd.xlane.f32.xlu0 %v2171_v26  ;;  %v2841_v48 = vpop.f32.mrf.mxu1  ;;  %v2113_v0 = vmul.f32 0.2, %v2081_v10  ;;  %v2052_v9 = vmul.f32 %v4028_v13, %v2009_v50  ;;  %v2175_v23 = vmul.f32 %v4234_v33, %v4234_v33 }
 0x368   : > { %v1851_v12 = vadd.f32 %v4032_v17, %v1798_v41  ;;  %v1813_v52 = vadd.f32 %v2841_v48, %v2761_v43  ;;  %v2174_v40 = vmul.f32 %v4225_v42, %v4225_v42  ;;  %v2083_v54 = vadd.f32 %v2051_v15, %v1852_v38  ;;  %v1582_v57 = vpop.f32.mrf.mxu0 }
 0x369   : > { %v1807_v62 = vpop.f32.mrf.mxu1  ;;  %v2112_v44 = vmul.f32 0.2, %v2080_v14  ;;  %v4246_v4 = vmax.f32 %v2081_v10, %v2113_v0 }
 0x36a   : > { %v2082_v2 = vadd.f32 %v2050_v3, %v1851_v12  ;;  %v1854_v24 = vadd.f32 %v4032_v17, %v1813_v52  ;;  %v1808_v37 = vadd.f32 %v1807_v62, %v1582_v57  ;;  %v2115_v28 = vmul.f32 0.2, %v2083_v54 }
 0x36b   : > { %2230 = vadd.xlane.f32.xlu1 %v2174_v40  ;;  %2228 = vadd.xlane.f32.xlu0 %v2173_v53  ;;  %v4238_v7 = vmax.f32 %v2080_v14, %v2112_v44 }
 0x36c   : > { %v2085_v18 = vadd.f32 %v2053_v6, %v1854_v24  ;;  %v1853_v20 = vadd.f32 %v4032_v17, %v1808_v37  ;;  %v2114_v22 = vmul.f32 0.2, %v2082_v2  ;;  %v2177_v17 = vmul.f32 %v4246_v4, %v4246_v4 }
 0x36d   : > { %v2176_v56 = vmul.f32 %v4238_v7, %v4238_v7  ;;  %v4254_v11 = vmax.f32 %v2083_v54, %v2115_v28 }
 0x36e   : > { %v2084_v55 = vadd.f32 %v2052_v9, %v1853_v20  ;;  %v4248_v8 = vmax.f32 %v2082_v2, %v2114_v22  ;;  %v2117_v30 = vmul.f32 0.2, %v2085_v18 }
 0x36f   : > { %2234 = vadd.xlane.f32.xlu1 %v2176_v56  ;;  %2232 = vadd.xlane.f32.xlu0 %v2175_v23  ;;  %v2179_v38 = vmul.f32 %v4254_v11, %v4254_v11 }
 0x370   : > { %v2178_v13 = vmul.f32 %v4248_v8, %v4248_v8  ;;  %v2116_v26 = vmul.f32 0.2, %v2084_v55  ;;  %v4262_v41 = vmax.f32 %v2085_v18, %v2117_v30 }
 0x372   : > { %v4256_v14 = vmax.f32 %v2084_v55, %v2116_v26  ;;  %v2181_v15 = vmul.f32 %v4262_v41, %v4262_v41 }
 0x373   : > { %2238 = vadd.xlane.f32.xlu1 %v2178_v13  ;;  %2236 = vadd.xlane.f32.xlu0 %v2177_v17 }
 0x374   : > { %v2180_v10 = vmul.f32 %v4256_v14, %v4256_v14 }
 0x377   : > { %2242 = vadd.xlane.f32.xlu1 %v2180_v10  ;;  %2240 = vadd.xlane.f32.xlu0 %v2179_v38 }
 0x37b   : > { %2244 = vadd.xlane.f32.xlu0 %v2181_v15 }
 0x3c1   : > { %v2185_v3 = vpop.xlane.xlu1 %2184 }
 0x3c2   : > { %v2247_v43 = vmax.f32 %v2185_v3, 1e-24 }
 0x3c4   : > { %3012 = vrsqrt.f32 %v2247_v43  ;;  %v2183_v48 = vpop.xlane.xlu0 %2182 }
 0x3c5   : > { %v2246_v50 = vmax.f32 %v2183_v48, 1e-24 }
 0x3c7   : > { %3014 = vrsqrt.f32 %v2246_v50 }
 0x3c8   : > { %v2189_v12 = vpop.xlane.xlu0 %2188 }
 0x3c9   : > { %v2249_v52 = vmax.f32 %v2189_v12, 1e-24 }
 0x3cb   : > { %3016 = vrsqrt.f32 %v2249_v52  ;;  %v2191_v40 = vpop.xlane.xlu1 %2190 }
 0x3cc   : > { %v2250_v53 = vmax.f32 %v2191_v40, 1e-24  ;;  %v2187_v54 = vpop.xlane.xlu0 %2186 }
 0x3cd   : > { %v2248_v57 = vmax.f32 %v2187_v54, 1e-24 }
 0x3ce   : > { %3018 = vrsqrt.f32 %v2250_v53 }
 0x3cf   : > { %3020 = vrsqrt.f32 %v2248_v57 }
 0x3d0   : > { %v2195_v62 = vpop.xlane.xlu1 %2194  ;;  %v2193_v44 = vpop.xlane.xlu0 %2192 }
 0x3d1   : > { %v3013_v0 = vpop.eup %3012  ;;  %v2252_v6 = vmax.f32 %v2195_v62, 1e-24  ;;  %v2251_v2 = vmax.f32 %v2193_v44, 1e-24 }
 0x3d2   : > { %v2311_v24 = vmul.f32 %v3013_v0, %v4048_v46 }
 0x3d3   : > { %3022 = vrsqrt.f32 %v2252_v6 }
 0x3d4   : > { %v3015_v37 = vpop.eup %3014  ;;  %2343 = vst [vmem:[%s3727_s19 + $0x8] sm:$0xff] %v2311_v24  ;;  %3024 = vrsqrt.f32 %v2251_v2  ;;  %v2199_v9 = vpop.xlane.xlu1 %2198 }
 0x3d5   : > { %v2197_v18 = vpop.xlane.xlu0 %2196  ;;  %v2310_v20 = vmul.f32 %v3015_v37, %v4056_v58  ;;  %v2254_v22 = vmax.f32 %v2199_v9, 1e-24 }
 0x3d6   : > { %v2253_v56 = vmax.f32 %v2197_v18, 1e-24 }
 0x3d7   : > { %2342 = vst [vmem:[%s3727_s19] sm:$0xff] %v2310_v20  ;;  %3026 = vrsqrt.f32 %v2254_v22 }
 0x3d8   : > { %v3017_v23 = vpop.eup %3016  ;;  %3028 = vrsqrt.f32 %v2253_v56  ;;  %v2203_v28 = vpop.xlane.xlu1 %2202 }
 0x3d9   : > { %v2201_v55 = vpop.xlane.xlu0 %2200  ;;  %v2313_v46 = vmul.f32 %v3017_v23, %v4064_v5  ;;  %v2256_v13 = vmax.f32 %v2203_v28, 1e-24 }
 0x3da   : > { %v2255_v26 = vmax.f32 %v2201_v55, 1e-24 }
 0x3db   : > { %v3019_v17 = vpop.eup %3018  ;;  %2345 = vst [vmem:[%s3727_s19 + $0x18] sm:$0xff] %v2313_v46  ;;  %3030 = vrsqrt.f32 %v2256_v13 }
 0x3dc   : > { %v3021_v30 = vpop.eup %3020  ;;  %v2314_v58 = vmul.f32 %v3019_v17, %v4080_v34  ;;  %3032 = vrsqrt.f32 %v2255_v26  ;;  %v2207_v10 = vpop.xlane.xlu1 %2206 }
 0x3dd   : > { %v2205_v38 = vpop.xlane.xlu0 %2204  ;;  %v2312_v15 = vmul.f32 %v3021_v30, %v4075_v29  ;;  %v2258_v3 = vmax.f32 %v2207_v10, 1e-24 }
 0x3de   : > { %v2257_v43 = vmax.f32 %v2205_v38, 1e-24  ;;  %2346 = vst [vmem:[%s3727_s19 + $0x20] sm:$0xff] %v2314_v58 }
 0x3df   : > { %2344 = vst [vmem:[%s3727_s19 + $0x10] sm:$0xff] %v2312_v15  ;;  %3034 = vrsqrt.f32 %v2258_v3 }
 0x3e0   : > { %v3023_v5 = vpop.eup %3022  ;;  %3036 = vrsqrt.f32 %v2257_v43  ;;  %v2211_v48 = vpop.xlane.xlu1 %2210 }
 0x3e1   : > { %v2209_v50 = vpop.xlane.xlu0 %2208  ;;  %v3025_v12 = vpop.eup %3024  ;;  %v2316_v52 = vmul.f32 %v3023_v5, %v4100_v59  ;;  %v2260_v34 = vmax.f32 %v2211_v48, 1e-24 }
 0x3e2   : > { %v2259_v40 = vmax.f32 %v2209_v50, 1e-24  ;;  %v2315_v53 = vmul.f32 %v3025_v12, %v4091_v49 }
 0x3e3   : > { %2348 = vst [vmem:[%s3727_s19 + $0x30] sm:$0xff] %v2316_v52  ;;  %3038 = vrsqrt.f32 %v2260_v34 }
 0x3e4   : > { %v3027_v29 = vpop.eup %3026  ;;  %2347 = vst [vmem:[%s3727_s19 + $0x28] sm:$0xff] %v2315_v53  ;;  %3040 = vrsqrt.f32 %v2259_v40  ;;  %v2215_v54 = vpop.xlane.xlu1 %2214 }
 0x3e5   : > { %v2213_v57 = vpop.xlane.xlu0 %2212  ;;  %v3029_v62 = vpop.eup %3028  ;;  %v2318_v44 = vmul.f32 %v3027_v29, %v4112_v16  ;;  %v2262_v0 = vmax.f32 %v2215_v54, 1e-24 }
 0x3e6   : > { %v2261_v6 = vmax.f32 %v2213_v57, 1e-24  ;;  %v2317_v59 = vmul.f32 %v3029_v62, %v4105_v1 }
 0x3e7   : > { %2350 = vst [vmem:[%s3727_s19 + $0x40] sm:$0xff] %v2318_v44  ;;  %3042 = vrsqrt.f32 %v2262_v0 }
 0x3e8   : > { %v3031_v49 = vpop.eup %3030  ;;  %2349 = vst [vmem:[%s3727_s19 + $0x38] sm:$0xff] %v2317_v59  ;;  %3044 = vrsqrt.f32 %v2261_v6  ;;  %v2219_v2 = vpop.xlane.xlu1 %2218 }
 0x3e9   : > { %v2217_v24 = vpop.xlane.xlu0 %2216  ;;  %v3033_v37 = vpop.eup %3032  ;;  %v2320_v9 = vmul.f32 %v3031_v49, %v4134_v45  ;;  %v2264_v18 = vmax.f32 %v2219_v2, 1e-24 }
 0x3ea   : > { %v2263_v20 = vmax.f32 %v2217_v24, 1e-24  ;;  %v2319_v16 = vmul.f32 %v3033_v37, %v4125_v35 }
 0x3eb   : > { %2352 = vst [vmem:[%s3727_s19 + $0x50] sm:$0xff] %v2320_v9  ;;  %3046 = vrsqrt.f32 %v2264_v18 }
 0x3ec   : > { %v3035_v1 = vpop.eup %3034  ;;  %2351 = vst [vmem:[%s3727_s19 + $0x48] sm:$0xff] %v2319_v16  ;;  %3048 = vrsqrt.f32 %v2263_v20  ;;  %v2223_v22 = vpop.xlane.xlu1 %2222 }
 0x3ed   : > { %v2221_v56 = vpop.xlane.xlu0 %2220  ;;  %v3037_v23 = vpop.eup %3036  ;;  %v2322_v28 = vmul.f32 %v3035_v1, %v4146_v63  ;;  %v2266_v55 = vmax.f32 %v2223_v22, 1e-24 }
 0x3ee   : > { %v2265_v46 = vmax.f32 %v2221_v56, 1e-24  ;;  %v2321_v45 = vmul.f32 %v3037_v23, %v4141_v61 }
 0x3ef   : > { %2354 = vst [vmem:[%s3727_s19 + $0x60] sm:$0xff] %v2322_v28  ;;  %3050 = vrsqrt.f32 %v2266_v55 }
 0x3f0   : > { %v3039_v35 = vpop.eup %3038  ;;  %2353 = vst [vmem:[%s3727_s19 + $0x58] sm:$0xff] %v2321_v45  ;;  %3052 = vrsqrt.f32 %v2265_v46  ;;  %v2227_v13 = vpop.xlane.xlu1 %2226 }
 0x3f1   : > { %v2225_v26 = vpop.xlane.xlu0 %2224  ;;  %v3041_v17 = vpop.eup %3040  ;;  %v2324_v30 = vmul.f32 %v3039_v35, %v4164_v32  ;;  %v2268_v58 = vmax.f32 %v2227_v13, 1e-24 }
 0x3f2   : > { %v2267_v10 = vmax.f32 %v2225_v26, 1e-24  ;;  %v2323_v63 = vmul.f32 %v3041_v17, %v4157_v31 }
 0x3f3   : > { %2356 = vst [vmem:[%s3727_s19 + $0x70] sm:$0xff] %v2324_v30  ;;  %3054 = vrsqrt.f32 %v2268_v58 }
 0x3f4   : > { %v3043_v61 = vpop.eup %3042  ;;  %2355 = vst [vmem:[%s3727_s19 + $0x68] sm:$0xff] %v2323_v63  ;;  %3056 = vrsqrt.f32 %v2267_v10  ;;  %v2231_v38 = vpop.xlane.xlu1 %2230 }
 0x3f5   : > { %v2229_v15 = vpop.xlane.xlu0 %2228  ;;  %v3045_v3 = vpop.eup %3044  ;;  %v2326_v43 = vmul.f32 %v3043_v61, %v4174_v51  ;;  %v2270_v5 = vmax.f32 %v2231_v38, 1e-24 }
 0x3f6   : > { %v2269_v48 = vmax.f32 %v2229_v15, 1e-24  ;;  %v2325_v32 = vmul.f32 %v3045_v3, %v4167_v39 }
 0x3f7   : > { %2358 = vst [vmem:[%s3727_s19 + $0x80] sm:$0xff] %v2326_v43  ;;  %3058 = vrsqrt.f32 %v2270_v5 }
 0x3f8   : > { %v3047_v31 = vpop.eup %3046  ;;  %2357 = vst [vmem:[%s3727_s19 + $0x78] sm:$0xff] %v2325_v32  ;;  %3060 = vrsqrt.f32 %v2269_v48  ;;  %v2235_v50 = vpop.xlane.xlu1 %2234 }
 0x3f9   : > { %v2233_v12 = vpop.xlane.xlu0 %2232  ;;  %v3049_v52 = vpop.eup %3048  ;;  %v2328_v34 = vmul.f32 %v3047_v31, %v4191_v25  ;;  %v2272_v40 = vmax.f32 %v2235_v50, 1e-24 }
 0x3fa   : > { %v2271_v53 = vmax.f32 %v2233_v12, 1e-24  ;;  %v2327_v51 = vmul.f32 %v3049_v52, %v4185_v19 }
 0x3fb   : > { %2360 = vst [vmem:[%s3727_s19 + $0x90] sm:$0xff] %v2328_v34  ;;  %3062 = vrsqrt.f32 %v2272_v40 }
 0x3fc   : > { %v3051_v39 = vpop.eup %3050  ;;  %2359 = vst [vmem:[%s3727_s19 + $0x88] sm:$0xff] %v2327_v51  ;;  %3064 = vrsqrt.f32 %v2271_v53  ;;  %v2239_v29 = vpop.xlane.xlu1 %2238 }
 0x3fd   : > { %v2237_v54 = vpop.xlane.xlu0 %2236  ;;  %v3053_v57 = vpop.eup %3052  ;;  %v2330_v62 = vmul.f32 %v3051_v39, %v4201_v60  ;;  %v2274_v44 = vmax.f32 %v2239_v29, 1e-24 }
 0x3fe   : > { %v2273_v0 = vmax.f32 %v2237_v54, 1e-24  ;;  %v2329_v25 = vmul.f32 %v3053_v57, %v4198_v36 }
 0x3ff   : > { %2362 = vst [vmem:[%s3727_s19 + $0xa0] sm:$0xff] %v2330_v62  ;;  %3066 = vrsqrt.f32 %v2274_v44 }
 0x400   : > { %v3055_v19 = vpop.eup %3054  ;;  %2361 = vst [vmem:[%s3727_s19 + $0x98] sm:$0xff] %v2329_v25  ;;  %3068 = vrsqrt.f32 %v2273_v0  ;;  %v2243_v6 = vpop.xlane.xlu1 %2242 }
 0x401   : > { %v2241_v59 = vpop.xlane.xlu0 %2240  ;;  %v3057_v49 = vpop.eup %3056  ;;  %v2332_v2 = vmul.f32 %v3055_v19, %v4215_v21  ;;  %v2276_v24 = vmax.f32 %v2243_v6, 1e-24 }
 0x402   : > { %v2275_v60 = vmax.f32 %v2241_v59, 1e-24  ;;  %v2331_v37 = vmul.f32 %v3057_v49, %v4210_v47 }
 0x403   : > { %2364 = vst [vmem:[%s3727_s19 + $0xb0] sm:$0xff] %v2332_v2  ;;  %3070 = vrsqrt.f32 %v2276_v24 }
 0x404   : > { %v3059_v36 = vpop.eup %3058  ;;  %2363 = vst [vmem:[%s3727_s19 + $0xa8] sm:$0xff] %v2331_v37  ;;  %3072 = vrsqrt.f32 %v2275_v60 }
 0x405   : > { %v2245_v9 = vpop.xlane.xlu0 %2244  ;;  %v3061_v18 = vpop.eup %3060  ;;  %v2334_v20 = vmul.f32 %v3059_v36, %v4225_v42 }
 0x406   : > { %v2277_v16 = vmax.f32 %v2245_v9, 1e-24  ;;  %v2333_v21 = vmul.f32 %v3061_v18, %v4218_v27 }
 0x407   : > { %2366 = vst [vmem:[%s3727_s19 + $0xc0] sm:$0xff] %v2334_v20 }
 0x408   : > { %3074 = vrsqrt.f32 %v2277_v16  ;;  %v3063_v1 = vpop.eup %3062  ;;  %2365 = vst [vmem:[%s3727_s19 + $0xb8] sm:$0xff] %v2333_v21 }
 0x409   : > { %v3065_v47 = vpop.eup %3064  ;;  %v2336_v22 = vmul.f32 %v3063_v1, %v4238_v7 }
 0x40a   : > { %v2335_v56 = vmul.f32 %v3065_v47, %v4234_v33 }
 0x40b   : > { %2368 = vst [vmem:[%s3727_s19 + $0xd0] sm:$0xff] %v2336_v22 }
 0x40c   : > { %v3067_v23 = vpop.eup %3066  ;;  %2367 = vst [vmem:[%s3727_s19 + $0xc8] sm:$0xff] %v2335_v56 }
 0x40d   : > { %v3069_v42 = vpop.eup %3068  ;;  %v2338_v28 = vmul.f32 %v3067_v23, %v4248_v8 }
 0x40e   : > { %v2337_v27 = vmul.f32 %v3069_v42, %v4246_v4 }
 0x40f   : > { %2370 = vst [vmem:[%s3727_s19 + $0xe0] sm:$0xff] %v2338_v28 }
 0x410   : > { %v3071_v55 = vpop.eup %3070  ;;  %2369 = vst [vmem:[%s3727_s19 + $0xd8] sm:$0xff] %v2337_v27 }
 0x411   : > { %v3073_v46 = vpop.eup %3072  ;;  %v2340_v45 = vmul.f32 %v3071_v55, %v4256_v14 }
 0x412   : > { %v2339_v7 = vmul.f32 %v3073_v46, %v4254_v11 }
 0x413   : > { %2372 = vst [vmem:[%s3727_s19 + $0xf0] sm:$0xff] %v2340_v45 }
 0x414   : > { %2371 = vst [vmem:[%s3727_s19 + $0xe8] sm:$0xff] %v2339_v7 }
 0x415   : > { %v3075_v35 = vpop.eup %3074 }
 0x416   : > { %v2341_v33 = vmul.f32 %v3075_v35, %v4262_v41 }
 0x418   : > { %2373 = vst [vmem:[%s3727_s19 + $0xf8] sm:$0xff] %v2341_v33 }
 0x419 PF: > { %s4461_s15 = sld [smem:[#allocation23_spill]]  ;;  %s2388_s13 = sshll.u32 %s3727_s19, 4  ;;  %s4337_s13 = int_to_ptr.vmem [resolvable:$true] %s2388_s13 }
 0x41a   : > { %s4462_s7 = sld [smem:[#allocation26_spill]]  ;;  %s2375_s23 = scalar_lea.sflag [#allocation5], %s3697_s18 }
 0x41b   : > { %s4463_s8 = sld [smem:[#allocation33_spill]]  ;;  %s3262_s5 = scalar_lea.vmem %s4337_s13, 4096 }
 0x41c   : > { %p3263_p0 = scmp.ne.s32.totalorder %s4337_s13, %s3262_s5  ;;  %s3415_s24 = smov [#allocation15]  }
 0x41d   : > { %s3266_s3 = sshll.u32 %s3415_s24, 4  ;;  %s3267_s3 = int_to_ptr.vmem [resolvable:$false] %s3266_s3 }
 0x41e   : > { %s3268_s14 = scalar_lea.vmem %s3267_s3, 8192  ;;  %p3269_p7 = scmp.lt.s32.totalorder %s4337_s13, %s3267_s3 }
 0x41f   : > { %s2585_s6 = sshll.u32 %s4461_s15, 12  ;;  %p3270_p9 = scmp.lt.s32.totalorder %s3268_s14, %s3262_s5 }
 0x420   : > { %p4465_p13 = scmp.ne.s32.totalorder %s4462_s7, 0 }
 0x421   : > { %s4464_s20 = smov %s4463_s8  ;;  %s4334_s21 = scalar_lea.hbm %s4463_s8, %s2585_s6 }
 0x422   : > { %p3264_p6 = pnand %p3263_p0, %p4465_p13  ;;  %p3271_p1 = por %p3270_p9, %p3269_p7 }
 0x424   : > { %p3265_p5 = pneg %p3264_p6 }
 0x426   : > { %p3272_p3 = pnand %p3271_p1, %p3265_p5 }
 0x428   : > { %3275 = shalt.err (!%p3272_p3)
}
 0x429   : > { %s3276_s19 = scalar_lea.hbm %s4334_s21, 4096  ;;  %s3280_s30 = scalar_lea.hbm %s4464_s20, 8192 }
 0x42a   : > { %p3277_p4 = scmp.ne.s32.totalorder %s4334_s21, %s3276_s19  ;;  %p3281_p2 = scmp.lt.s32.totalorder %s4334_s21, %s4464_s20 }
 0x42b   : > { %p3282_p11 = scmp.lt.s32.totalorder %s3280_s30, %s3276_s19 }
 0x42c   : > { %p3278_p8 = pnand %p3277_p4, %p4465_p13 }
 0x42d   : > { %p3283_p12 = por %p3282_p11, %p3281_p2 }
 0x42e   : > { %p3279_p10 = pneg %p3278_p8 }
 0x430   : > { %p3284_p0 = pnand %p3283_p12, %p3279_p10 }
 0x432   : > { %3287 = shalt.err (!%p3284_p0)
}
 0x433   : > { %s3416_s22 = smov 128   ;;  %s3417_s16 = smov 8  }
 0x434   : > { %2866 = dma.vmem_to_hbm [thread:$0]  (%p4465_p13), %s4337_s13, 4096, %s4334_s21, %s2375_s23, %s3416_s22, %s3416_s22, %s3417_s16  }
 0x435 PF: > { %p2906_p6 = scmp.ge.s32.totalorder %s3398_s11, 2  ;;  %s2403_s8 = sand.u32 1, %s3370_s27  }
 0x436   : > { %p4466_p5 = scmp.ne.s32.totalorder %s4444_s2, 0  ;;  %s2404_s5 = scalar_lea.sflag [#allocation5], %s2403_s8 }
 0x438   : > { %p2892_p7 = pnand %p2906_p6, %p4466_p5 }
 0x43a   : > { %p2893_p9 = pneg %p2892_p7 }
 0x43c   : > { %3353 = dma.done.wait (%p2893_p9), %s2404_s5, 4096  }
 0x43d   : > { %3355 = vsyncadd (%p2893_p9), %s2404_s5, 4294963200  ;;  %s28_s11 = sadd.s32 1, %s3398_s11   ;;  %s4467_s18 = sld [smem:[#allocation27_spill]] }
 0x43e   : > { %p25_p1 = scmp.ge.s32.totalorder %s28_s11, 6   ;;  %s4468_s7 = sld [smem:[#allocation24_spill]] }
 0x43f   : > { %s4469_s21 = sld [smem:[#allocation25_spill]]  ;;  %s4470_s24 = smov %s3362_s25 }
 0x440   : > { %s4471_s25 = smov %s3366_s26  ;;  %s4472_s26 = smov %s3659_s4 }
 0x441   : > { %s4473_s27 = smov %s3374_s28  ;;  %s4474_s28 = smov %s3378_s29 }
 0x442   : > { %s4476_s30 = smov %s3390_s9  ;;  %s4477_s8 = smov %s3394_s10 }
 0x443   : > { %s4475_s29 = smov %s4467_s18  ;;  %27 = sbr.rel (!%p25_p1) target bundleno = 20 (0x14), region = 135 }
 0x444   : > { %s4478_s9 = smov %s4468_s7 }
 0x445   : > { %s4479_s10 = smov %s4469_s21 }
 0x448   :  { %2409 = vsyncpa [#allocation4], 1 }
 0x449   :  { %2411 = vsyncpa [#allocation4 + $0x1], 1 }
 0x44a   :  { %2412 = vsyncpa [#allocation7], 1 }
 0x44b   :  { %2414 = vsyncpa [#allocation7 + $0x1], 1 }
 0x44c   :  { %2415 = vsyncpa [#allocation10], 1 }
 0x44d   :  { %2416 = vsyncpa [#allocation13], 1 }
 0x44e   :  { %2417 = vsyncpa [#allocation5], 1 }
 0x44f   :  { %2419 = vsyncpa [#allocation5 + $0x1], 1 }

</bundles_post_ra>
